<compile_context>
chip_gen: v5e
topology: v5e:2x2
jax: 0.10.0
libtpu: 0.0.40
codegen_flags: <defaults>
</compile_context>

<pallas_src>
import functools

import jax
import jax.numpy as jnp
from jax.experimental import pallas as pl
from jax.experimental.pallas import tpu as pltpu

IN_DIM = 784
HIDDEN = 28 * 28   # 784
OUT_DIM = 10
OUT_PAD = 128      # lane-dense output width (last dim padded 10 -> 128)


def mlp_kernel(x_ref, w1_ref, b1_ref, w2_ref, b2_ref, out_ref):
    # x_ref:  (tm, 784)   bf16   (streamed per grid step)
    # w1_ref: (784, 784)  bf16   (VMEM-resident, constant index_map)
    # b1_ref: (1, 784)    f32
    # w2_ref: (784, 128)  bf16   (zero-padded 10 -> 128 lanes)
    # b2_ref: (1, 128)    f32
    # out_ref:(tm, 128)   f32    (unmasked lane-dense stores)
    h = jnp.dot(x_ref[...], w1_ref[...],
                preferred_element_type=jnp.float32) + b1_ref[...]
    y = jnp.dot(h.astype(jnp.bfloat16), w2_ref[...],
                preferred_element_type=jnp.float32) + b2_ref[...]
    out_ref[...] = y


@functools.partial(jax.jit, static_argnames=("block_m",))
def mlp_forward(x, w1, b1, w2p, b2p, *, block_m=256):
    """Forward pass.  Returns (output, x) exactly like the PyTorch module."""
    B = x.shape[0]
    # Batch tile: multiple of 8 (sublane), capped at block_m (256 keeps MXU rows
    # full on v6e/v7x and is a multiple of 128 for v5e).  Pad B up to a multiple.
    tm = block_m if B >= block_m else ((B + 7) // 8) * 8
    Bp = pl.cdiv(B, tm) * tm

    xb = x.astype(jnp.bfloat16)          # bf16 stream -> halves x DMA bytes
    if Bp != B:
        xb = jnp.pad(xb, ((0, Bp - B), (0, 0)))

    out_padded = pl.pallas_call(
        mlp_kernel,
        out_shape=jax.ShapeDtypeStruct((Bp, OUT_PAD), jnp.float32),
        grid_spec=pltpu.PrefetchScalarGridSpec(
            num_scalar_prefetch=0,
            grid=(Bp // tm,),
            in_specs=[
                pl.BlockSpec((tm, IN_DIM), lambda i: (i, 0)),       # x tile (streamed)
                pl.BlockSpec((IN_DIM, HIDDEN), lambda i: (0, 0)),   # w1 (VMEM-resident)
                pl.BlockSpec((1, HIDDEN), lambda i: (0, 0)),        # b1
                pl.BlockSpec((HIDDEN, OUT_PAD), lambda i: (0, 0)),  # w2 (lane-padded)
                pl.BlockSpec((1, OUT_PAD), lambda i: (0, 0)),       # b2
            ],
            out_specs=pl.BlockSpec((tm, OUT_PAD), lambda i: (i, 0)),
        ),
        compiler_params=pltpu.CompilerParams(
            dimension_semantics=("parallel",),  # shard batch tiles across v7x's 2 TCs
        ),
    )(xb, w1, b1, w2p, b2p)

    out = out_padded[:B, :OUT_DIM]
    return out, x


def init_params(key):
    """nn.Linear-style U(-1/sqrt(fan_in), +1/sqrt(fan_in)) init, [in, out] layout."""
    k1, k2, k3, k4 = jax.random.split(key, 4)
    bound1 = 1.0 / jnp.sqrt(IN_DIM)
    bound2 = 1.0 / jnp.sqrt(HIDDEN)
    w1 = jax.random.uniform(k1, (IN_DIM, HIDDEN), jnp.float32, -bound1, bound1)
    b1 = jax.random.uniform(k2, (1, HIDDEN), jnp.float32, -bound1, bound1)
    w2 = jax.random.uniform(k3, (HIDDEN, OUT_DIM), jnp.float32, -bound2, bound2)
    b2 = jax.random.uniform(k4, (1, OUT_DIM), jnp.float32, -bound2, bound2)
    return w1, b1, w2, b2


def pack_params(w1, b1, w2, b2):
    """Kernel-format params: bf16 weights (half the DMA, native MXU dtype),
    f32 biases, output layer zero-padded 10 -> 128 lanes for unmasked stores."""
    w1b = w1.astype(jnp.bfloat16)
    w2p = jnp.zeros((HIDDEN, OUT_PAD), jnp.bfloat16).at[:, :OUT_DIM].set(
        w2.astype(jnp.bfloat16))
    b2p = jnp.zeros((1, OUT_PAD), jnp.float32).at[:, :OUT_DIM].set(b2)
    return w1b, b1, w2p, b2p


if __name__ == "__main__":
    key = jax.random.PRNGKey(0)
    pkey, xkey = jax.random.split(key)
    w1, b1, w2, b2 = init_params(pkey)
    w1b, b1f, w2p, b2p = pack_params(w1, b1, w2, b2)

    batch = 8
    x = jax.random.normal(xkey, (batch, IN_DIM), jnp.float32)

    out, x_echo = mlp_forward(x, w1b, b1f, w2p, b2p)
    jax.block_until_ready((out, x_echo))

    # Reference with the same bf16-input / f32-accumulate numerics as the kernel.
    h_ref = jnp.dot(x.astype(jnp.bfloat16).astype(jnp.float32),
                    w1b.astype(jnp.float32)) + b1
    ref = jnp.dot(h_ref.astype(jnp.bfloat16).astype(jnp.float32),
                  w2.astype(jnp.bfloat16).astype(jnp.float32)) + b2

    assert out.shape == (batch, OUT_DIM)
    assert x_echo.shape == (batch, IN_DIM)
    max_err = float(jnp.max(jnp.abs(out - ref)))
    assert jnp.allclose(out, ref, atol=5e-3, rtol=5e-3), f"max_err={max_err}"
    assert jnp.array_equal(x_echo, x)

    print("KERNEL_OK")
</pallas_src>

<mosaic_0001>
module attributes {stable_mosaic.version = 11 : i64} {
  func.func @mlp_kernel(%arg0: i32, %arg1: memref<8x784xbf16, #tpu.memory_space<vmem>>, %arg2: memref<784x784xbf16, #tpu.memory_space<vmem>>, %arg3: memref<1x784xf32, #tpu.memory_space<vmem>>, %arg4: memref<784x128xbf16, #tpu.memory_space<vmem>>, %arg5: memref<1x128xf32, #tpu.memory_space<vmem>>, %arg6: memref<8x128xf32, #tpu.memory_space<vmem>>) attributes {dimension_semantics = [#tpu.dimension_semantics<parallel>], iteration_bounds = array<i64: 1>, scalar_prefetch = 0 : i64, scratch_operands = 0 : i64, tpu.core_type = #tpu.core_type<tc>, window_params = [{transform_indices = @transform_0, window_bounds = array<i64: 8, 784>}, {pipeline_mode = #tpu.pipeline_mode<synchronous>, transform_indices = @transform_1, window_bounds = array<i64: 784, 784>}, {pipeline_mode = #tpu.pipeline_mode<synchronous>, transform_indices = @transform_2, window_bounds = array<i64: 1, 784>}, {pipeline_mode = #tpu.pipeline_mode<synchronous>, transform_indices = @transform_3, window_bounds = array<i64: 784, 128>}, {pipeline_mode = #tpu.pipeline_mode<synchronous>, transform_indices = @transform_4, window_bounds = array<i64: 1, 128>}, {transform_indices = @transform_5, window_bounds = array<i64: 8, 128>}]} {
    %c0 = arith.constant 0 : index
    %c0_0 = arith.constant 0 : index
    %0 = vector.load %arg1[%c0, %c0_0] : memref<8x784xbf16, #tpu.memory_space<vmem>>, vector<8x784xbf16>
    %c0_1 = arith.constant 0 : index
    %c0_2 = arith.constant 0 : index
    %1 = vector.load %arg2[%c0_1, %c0_2] : memref<784x784xbf16, #tpu.memory_space<vmem>>, vector<784x784xbf16>
    %cst = arith.constant dense<0.000000e+00> : vector<8x784xf32>
    %2 = tpu.matmul %0, %1, %cst {dimension_numbers = #tpu.dot_dimension_numbers<[1], [0], [0], [1], [0, 0, 1, 1], [], []>} : vector<8x784xbf16>, vector<784x784xbf16>, vector<8x784xf32> -> vector<8x784xf32>
    %c0_3 = arith.constant 0 : index
    %c0_4 = arith.constant 0 : index
    %3 = vector.load %arg3[%c0_3, %c0_4] : memref<1x784xf32, #tpu.memory_space<vmem>>, vector<1x784xf32>
    %4 = vector.broadcast %3 : vector<1x784xf32> to vector<8x784xf32>
    %5 = arith.addf %2, %4 : vector<8x784xf32>
    %6 = arith.truncf %5 : vector<8x784xf32> to vector<8x784xbf16>
    %c0_5 = arith.constant 0 : index
    %c0_6 = arith.constant 0 : index
    %7 = vector.load %arg4[%c0_5, %c0_6] : memref<784x128xbf16, #tpu.memory_space<vmem>>, vector<784x128xbf16>
    %cst_7 = arith.constant dense<0.000000e+00> : vector<8x128xf32>
    %8 = tpu.matmul %6, %7, %cst_7 {dimension_numbers = #tpu.dot_dimension_numbers<[1], [0], [0], [1], [0, 0, 1, 1], [], []>} : vector<8x784xbf16>, vector<784x128xbf16>, vector<8x128xf32> -> vector<8x128xf32>
    %c0_8 = arith.constant 0 : index
    %c0_9 = arith.constant 0 : index
    %9 = vector.load %arg5[%c0_8, %c0_9] : memref<1x128xf32, #tpu.memory_space<vmem>>, vector<1x128xf32>
    %10 = vector.broadcast %9 : vector<1x128xf32> to vector<8x128xf32>
    %11 = arith.addf %8, %10 : vector<8x128xf32>
    %c0_10 = arith.constant 0 : index
    %c0_11 = arith.constant 0 : index
    %12 = vector.load %arg6[%c0_10, %c0_11] : memref<8x128xf32, #tpu.memory_space<vmem>>, vector<8x128xf32>
    tpu.vector_store %arg6[%c0_10, %c0_11], %11 {strides = array<i32>} : memref<8x128xf32, #tpu.memory_space<vmem>>, vector<8x128xf32>,
    return
  }
  func.func @transform_0(%arg0: i32) -> (i32, i32) {
    %c0_i32 = arith.constant 0 : i32
    %c0_i32_0 = arith.constant 0 : i32
    return %arg0, %c0_i32 : i32, i32
  }
  func.func @transform_1(%arg0: i32) -> (i32, i32) {
    %c0_i32 = arith.constant 0 : i32
    %c0_i32_0 = arith.constant 0 : i32
    %c0_i32_1 = arith.constant 0 : i32
    return %c0_i32, %c0_i32_0 : i32, i32
  }
  func.func @transform_2(%arg0: i32) -> (i32, i32) {
    %c0_i32 = arith.constant 0 : i32
    %c0_i32_0 = arith.constant 0 : i32
    %c0_i32_1 = arith.constant 0 : i32
    return %c0_i32, %c0_i32_0 : i32, i32
  }
  func.func @transform_3(%arg0: i32) -> (i32, i32) {
    %c0_i32 = arith.constant 0 : i32
    %c0_i32_0 = arith.constant 0 : i32
    %c0_i32_1 = arith.constant 0 : i32
    return %c0_i32, %c0_i32_0 : i32, i32
  }
  func.func @transform_4(%arg0: i32) -> (i32, i32) {
    %c0_i32 = arith.constant 0 : i32
    %c0_i32_0 = arith.constant 0 : i32
    %c0_i32_1 = arith.constant 0 : i32
    return %c0_i32, %c0_i32_0 : i32, i32
  }
  func.func @transform_5(%arg0: i32) -> (i32, i32) {
    %c0_i32 = arith.constant 0 : i32
    %c0_i32_0 = arith.constant 0 : i32
    return %arg0, %c0_i32 : i32, i32
  }
}

</mosaic_0001>

<bundles_post_ra>
// kernel: mlp_forward.1
= control target key start
LH: loop header
LB: loop body
LE: loop exit
PB: predicated region body
PF: predicated region fallthrough
CT: control target
= control target key end

     0   :  { %10 = vsyncpa [#allocation3], 0  ;;  %s5742_s0 = inlined_call_operand.vmem [shape: bf16[8,784], index: 0, kind: input, shape index: {}]   ;;  %s5743_s1 = inlined_call_operand.hbm [shape: bf16[784,784], index: 1, kind: input, shape index: {}]   ;;  %s5744_s2 = inlined_call_operand.hbm [shape: f32[1,784], index: 2, kind: input, shape index: {}]   ;;  %s5745_s3 = inlined_call_operand.hbm [shape: bf16[784,128], index: 3, kind: input, shape index: {}]   ;;  %s5746_s4 = inlined_call_operand.hbm [shape: f32[1,128], index: 4, kind: input, shape index: {}]   ;;  %s5747_s5 = inlined_call_operand.hbm [shape: f32[8,128], index: 5, kind: output, shape index: {}]  }
   0x1   :  { %11 = vsyncpa [#allocation6], 0 }
   0x2   :  { %12 = vsyncpa [#allocation9], 0  ;;  %s34_s20 = sshll.u32 %s5744_s2, 4  ;;  %s35_s20 = int_to_ptr.hbm [resolvable:$true] %s34_s20 }
   0x3   :  { %13 = vsyncpa [#allocation4], 0  ;;  %s5546_s21 = smov [#allocation5]   ;;  %s20_s25 = sshll.u32 %s5743_s1, 4  ;;  %s21_s25 = int_to_ptr.hbm [resolvable:$true] %s20_s25 }
   0x4   :  { %s36_s22 = sshll.u32 %s5546_s21, 4  ;;  %s5547_s26 = smov [#allocation2]   ;;  %s37_s22 = int_to_ptr.vmem [resolvable:$true] %s36_s22 }
   0x5   :  { %39 = dma.hbm_to_vmem [thread:$0]  %s35_s20, 112, %s37_s22, [#allocation6]  }
   0x6   :  { %s22_s27 = sshll.u32 %s5547_s26, 4  ;;  %s5548_s28 = smov 448   ;;  %s23_s27 = int_to_ptr.vmem [resolvable:$true] %s22_s27 }
   0x7   :  { %s5549_s29 = smov 28   ;;  %s44_s2 = sshll.u32 %s5745_s3, 4  ;;  %s45_s2 = int_to_ptr.hbm [resolvable:$true] %s44_s2 }
   0x8   :  { %28 = dma.hbm_to_vmem [thread:$0]  %s21_s25, 43904, %s23_s27, [#allocation3], %s5548_s28, %s5548_s28, %s5549_s29  }
   0x9   :  { %s5550_s7 = smov [#allocation7]   ;;  %s58_s1 = sshll.u32 %s5746_s4, 4  ;;  %s59_s1 = int_to_ptr.hbm [resolvable:$true] %s58_s1 }
   0xa   :  { %s46_s8 = sshll.u32 %s5550_s7, 4  ;;  %s5551_s11 = smov 64   ;;  %s47_s8 = int_to_ptr.vmem [resolvable:$true] %s46_s8 }
   0xb   :  { %s5552_s12 = smov 4   ;;  %s5553_s13 = smov [#allocation8]  }
   0xc   :  { %52 = dma.hbm_to_vmem [thread:$0]  %s45_s2, 6272, %s47_s8, [#allocation6], %s5551_s11, %s5551_s11, %s5552_s12  }
   0xd   :  { %s60_s14 = sshll.u32 %s5553_s13, 4  ;;  %s61_s14 = int_to_ptr.vmem [resolvable:$true] %s60_s14 }
   0xe   :  { %63 = dma.hbm_to_vmem [thread:$0]  %s59_s1, 16, %s61_s14, [#allocation9]  }
   0xf   :  { %5538 = dma.done.wait [#allocation3], 43904  }
  0x10   :  { %5539 = vsyncadd [#allocation3], 4294923392 }
  0x11   :  { %5540 = dma.done.wait [#allocation6], 6384  }
  0x12   :  { %5541 = vsyncadd [#allocation6], 4294960912 }
  0x13   :  { %5542 = dma.done.wait [#allocation9], 16  }
  0x14   :  { %5543 = vsyncadd [#allocation9], 4294967280  ;;  %v3637_v0 = vld [vmem:[#allocation2 + $0x188] sm:$0xf]  ;;  %v5067_v1 = vld [vmem:[#allocation2 + $0x1a0] sm:$0xf0] }
  0x15   :  { %v3861_v2 = vld [vmem:[#allocation2 + $0x348] sm:$0xf]  ;;  %v3638_v3 = vor.u32 %v5067_v1, %v3637_v0  ;;  %v5123_v4 = vld [vmem:[#allocation2 + $0x360] sm:$0xf0]  ;;  %v3609_v11 = vld [vmem:[#allocation2 + $0x150] sm:$0xf] }
  0x16   :  { %v4085_v5 = vld [vmem:[#allocation2 + $0x508] sm:$0xf]  ;;  %v5179_v6 = vld [vmem:[#allocation2 + $0x520] sm:$0xf0]  ;;  %v3862_v7 = vor.u32 %v5123_v4, %v3861_v2  ;;  %v5060_v13 = vld [vmem:[#allocation2 + $0x168] sm:$0xf0] }
  0x17   :  { %v4086_v8 = vor.u32 %v5179_v6, %v4085_v5  ;;  %v4309_v9 = vld [vmem:[#allocation2 + $0x6c8] sm:$0xf]  ;;  %v5235_v10 = vld [vmem:[#allocation2 + $0x6e0] sm:$0xf0]  ;;  %2285 = vmatpush.bf16.msra.mxu0 %v3638_v3  ;;  %v3833_v14 = vld [vmem:[#allocation2 + $0x310] sm:$0xf]  ;;  %v3610_v16 = vor.u32 %v5060_v13, %v3609_v11 }
  0x18   :  { %v4310_v12 = vor.u32 %v5235_v10, %v4309_v9  ;;  %v5116_v15 = vld [vmem:[#allocation2 + $0x328] sm:$0xf0]  ;;  %2298 = vmatpush.bf16.msra.mxu1 %v3862_v7  ;;  %v4057_v18 = vld [vmem:[#allocation2 + $0x4d0] sm:$0xf]  ;;  %v3581_v23 = vld [vmem:[#allocation2 + $0x118] sm:$0xf] }
  0x19   :  { %2311 = vmatpush.bf16.msra.mxu2 %v4086_v8  ;;  %v3834_v17 = vor.u32 %v5116_v15, %v3833_v14  ;;  %v5172_v19 = vld [vmem:[#allocation2 + $0x4e8] sm:$0xf0]  ;;  %v4281_v20 = vld [vmem:[#allocation2 + $0x690] sm:$0xf]  ;;  %v5053_v24 = vld [vmem:[#allocation2 + $0x130] sm:$0xf0] }
  0x1a   :  { %2324 = vmatpush.bf16.msra.mxu3 %v4310_v12  ;;  %v4058_v21 = vor.u32 %v5172_v19, %v4057_v18  ;;  %v5228_v22 = vld [vmem:[#allocation2 + $0x6a8] sm:$0xf0]  ;;  %v3805_v26 = vld [vmem:[#allocation2 + $0x2d8] sm:$0xf]  ;;  %v5109_v27 = vld [vmem:[#allocation2 + $0x2f0] sm:$0xf0]  ;;  %v3582_v29 = vor.u32 %v5053_v24, %v3581_v23 }
  0x1b   :  { %v4282_v25 = vor.u32 %v5228_v22, %v4281_v20  ;;  %v4029_v28 = vld [vmem:[#allocation2 + $0x498] sm:$0xf]  ;;  %2286 = vmatpush.bf16.msra.mxu0 %v3610_v16  ;;  %v5165_v30 = vld [vmem:[#allocation2 + $0x4b0] sm:$0xf0]  ;;  %v3806_v33 = vor.u32 %v5109_v27, %v3805_v26  ;;  %v3553_v35 = vld [vmem:[#allocation2 + $0xe0] sm:$0xf] }
  0x1c   :  { %v4253_v31 = vld [vmem:[#allocation2 + $0x658] sm:$0xf]  ;;  %v5221_v32 = vld [vmem:[#allocation2 + $0x670] sm:$0xf0]  ;;  %2299 = vmatpush.bf16.msra.mxu1 %v3834_v17  ;;  %v4030_v34 = vor.u32 %v5165_v30, %v4029_v28  ;;  %v5046_v36 = vld [vmem:[#allocation2 + $0xf8] sm:$0xf0] }
  0x1d   :  { %2312 = vmatpush.bf16.msra.mxu2 %v4058_v21  ;;  %v3777_v37 = vld [vmem:[#allocation2 + $0x2a0] sm:$0xf]  ;;  %v4254_v38 = vor.u32 %v5221_v32, %v4253_v31  ;;  %v5102_v39 = vld [vmem:[#allocation2 + $0x2b8] sm:$0xf0]  ;;  %v3554_v44 = vor.u32 %v5046_v36, %v3553_v35  ;;  %v3525_v47 = vld [vmem:[#allocation2 + $0xa8] sm:$0xf] }
  0x1e   :  { %2325 = vmatpush.bf16.msra.mxu3 %v4282_v25  ;;  %v4001_v40 = vld [vmem:[#allocation2 + $0x460] sm:$0xf]  ;;  %v5158_v41 = vld [vmem:[#allocation2 + $0x478] sm:$0xf0]  ;;  %v3778_v45 = vor.u32 %v5102_v39, %v3777_v37  ;;  %v5039_v48 = vld [vmem:[#allocation2 + $0xc0] sm:$0xf0] }
  0x1f   :  { %v4225_v42 = vld [vmem:[#allocation2 + $0x620] sm:$0xf]  ;;  %v5214_v43 = vld [vmem:[#allocation2 + $0x638] sm:$0xf0]  ;;  %2287 = vmatpush.bf16.msra.mxu0 %v3582_v29  ;;  %v4002_v46 = vor.u32 %v5158_v41, %v4001_v40  ;;  %v3749_v49 = vld [vmem:[#allocation2 + $0x268] sm:$0xf]  ;;  %v3526_v56 = vor.u32 %v5039_v48, %v3525_v47 }
  0x20   :  { %2300 = vmatpush.bf16.msra.mxu1 %v3806_v33  ;;  %v4226_v50 = vor.u32 %v5214_v43, %v4225_v42  ;;  %v5095_v51 = vld [vmem:[#allocation2 + $0x280] sm:$0xf0]  ;;  %v3973_v52 = vld [vmem:[#allocation2 + $0x428] sm:$0xf]  ;;  %v3497_v59 = vld [vmem:[#allocation2 + $0x70] sm:$0xf] }
  0x21   :  { %2313 = vmatpush.bf16.msra.mxu2 %v4030_v34  ;;  %v5151_v53 = vld [vmem:[#allocation2 + $0x440] sm:$0xf0]  ;;  %v4197_v54 = vld [vmem:[#allocation2 + $0x5e8] sm:$0xf]  ;;  %v3750_v57 = vor.u32 %v5095_v51, %v3749_v49  ;;  %v5032_v60 = vld [vmem:[#allocation2 + $0x88] sm:$0xf0] }
  0x22   :  { %2326 = vmatpush.bf16.msra.mxu3 %v4254_v38  ;;  %v5207_v55 = vld [vmem:[#allocation2 + $0x600] sm:$0xf0]  ;;  %v3974_v58 = vor.u32 %v5151_v53, %v3973_v52  ;;  %v3721_v61 = vld [vmem:[#allocation2 + $0x230] sm:$0xf]  ;;  %v5088_v63 = vld [vmem:[#allocation2 + $0x248] sm:$0xf0]  ;;  %v3498_v4 = vor.u32 %v5032_v60, %v3497_v59 }
  0x23   :  { %2288 = vmatpush.bf16.msra.mxu0 %v3554_v44  ;;  %v4198_v62 = vor.u32 %v5207_v55, %v4197_v54  ;;  %v3945_v0 = vld [vmem:[#allocation2 + $0x3f0] sm:$0xf]  ;;  %v5144_v1 = vld [vmem:[#allocation2 + $0x408] sm:$0xf0]  ;;  %v3722_v5 = vor.u32 %v5088_v63, %v3721_v61  ;;  %v3469_v7 = vld [vmem:[#allocation2 + $0x38] sm:$0xf] }
  0x24   :  { %2301 = vmatpush.bf16.msra.mxu1 %v3778_v45  ;;  %v4169_v2 = vld [vmem:[#allocation2 + $0x5b0] sm:$0xf]  ;;  %v5200_v3 = vld [vmem:[#allocation2 + $0x5c8] sm:$0xf0]  ;;  %v3946_v6 = vor.u32 %v5144_v1, %v3945_v0  ;;  %v5025_v8 = vld [vmem:[#allocation2 + $0x50] sm:$0xf0] }
  0x25   :  { %2314 = vmatpush.bf16.msra.mxu2 %v4002_v46  ;;  %v3693_v9 = vld [vmem:[#allocation2 + $0x1f8] sm:$0xf]  ;;  %v4170_v10 = vor.u32 %v5200_v3, %v4169_v2  ;;  %v5081_v11 = vld [vmem:[#allocation2 + $0x210] sm:$0xf0]  ;;  %v3470_v16 = vor.u32 %v5025_v8, %v3469_v7  ;;  %v3441_v17 = vld [vmem:[#allocation2] sm:$0xf] }
  0x26   :  { %2327 = vmatpush.bf16.msra.mxu3 %v4226_v50  ;;  %v3917_v12 = vld [vmem:[#allocation2 + $0x3b8] sm:$0xf]  ;;  %v5137_v13 = vld [vmem:[#allocation2 + $0x3d0] sm:$0xf0]  ;;  %v5018_v18 = vld [vmem:[#allocation2 + $0x18] sm:$0xf0]  ;;  %v3694_v20 = vor.u32 %v5081_v11, %v3693_v9 }
  0x27   :  { %2289 = vmatpush.bf16.msra.mxu0 %v3526_v56  ;;  %v4141_v14 = vld [vmem:[#allocation2 + $0x578] sm:$0xf]  ;;  %v5193_v15 = vld [vmem:[#allocation2 + $0x590] sm:$0xf0]  ;;  %v3665_v19 = vld [vmem:[#allocation2 + $0x1c0] sm:$0xf]  ;;  %v3918_v21 = vor.u32 %v5137_v13, %v3917_v12  ;;  %v3442_v32 = vor.u32 %v5018_v18, %v3441_v17 }
  0x28   :  { %2302 = vmatpush.bf16.msra.mxu1 %v3750_v57  ;;  %v5074_v22 = vld [vmem:[#allocation2 + $0x1d8] sm:$0xf0]  ;;  %v3889_v23 = vld [vmem:[#allocation2 + $0x380] sm:$0xf]  ;;  %v4142_v25 = vor.u32 %v5193_v15, %v4141_v14  ;;  %v82_v28 = vld [vmem:[%s5742_s0 + $0x8] sm:$0xff]  ;;  %vm2281_vm0 = vcmask 130048  }
  0x29   :  { %2315 = vmatpush.bf16.msra.mxu2 %v3974_v58  ;;  %v5130_v24 = vld [vmem:[#allocation2 + $0x398] sm:$0xf0]  ;;  %v4113_v26 = vld [vmem:[#allocation2 + $0x540] sm:$0xf]  ;;  %v4533_v29 = vld [vmem:[#allocation2 + $0x888] sm:$0xf]  ;;  %v3666_v36 = vor.u32 %v5074_v22, %v3665_v19  ;;  %v499_v40 = vunpack.c.l.b16 %v82_v28  ;;  %v500_v41 = vunpack.c.h.b16 %v82_v28 }
  0x2a   :  { %2328 = vmatpush.bf16.msra.mxu3 %v4198_v62  ;;  %v5186_v27 = vld [vmem:[#allocation2 + $0x558] sm:$0xf0]  ;;  %v5291_v30 = vld [vmem:[#allocation2 + $0x8a0] sm:$0xf0]  ;;  %v4757_v31 = vld [vmem:[#allocation2 + $0xa48] sm:$0xf]  ;;  %v3890_v37 = vor.u32 %v5130_v24, %v3889_v23 }
  0x2b   :  { %2290 = vmatpush.bf16.msra.mxu0 %v3498_v4  ;;  %v5347_v33 = vld [vmem:[#allocation2 + $0xa60] sm:$0xf0]  ;;  %v5064_v34 = vld [vmem:[#allocation2 + $0x18c] sm:$0xf]  ;;  %v3639_v35 = vld [vmem:[#allocation2 + $0x1a4] sm:$0xf0]  ;;  %v4114_v42 = vor.u32 %v5186_v27, %v4113_v26  ;;  %v4534_v43 = vor.u32 %v5291_v30, %v4533_v29  ;;  %v5600_v55 = vpack.c.b16 %v499_v40, %v499_v40  ;;  %v5602_v56 = vpack.c.b16 %v500_v41, %v500_v41 }
  0x2c   :  { %2303 = vmatpush.bf16.msra.mxu1 %v3722_v5  ;;  %v4785_v38 = vld [vmem:[#allocation2 + $0xa80] sm:$0xf]  ;;  %v5354_v39 = vld [vmem:[#allocation2 + $0xa98] sm:$0xf0]  ;;  %v5120_v44 = vld [vmem:[#allocation2 + $0x34c] sm:$0xf]  ;;  %v4758_v46 = vor.u32 %v5347_v33, %v4757_v31  ;;  %v3642_v47 = vor.u32 %v5064_v34, %v3639_v35 }
  0x2d   :  { %2316 = vmatpush.bf16.msra.mxu2 %v3946_v6  ;;  %v3863_v45 = vld [vmem:[#allocation2 + $0x364] sm:$0xf0]  ;;  %v4505_v48 = vld [vmem:[#allocation2 + $0x850] sm:$0xf]  ;;  %v5284_v49 = vld [vmem:[#allocation2 + $0x868] sm:$0xf0]  ;;  %v4786_v51 = vor.u32 %v5354_v39, %v4785_v38 }
  0x2e   :  { %2329 = vmatpush.bf16.msra.mxu3 %v4170_v10  ;;  %v4729_v50 = vld [vmem:[#allocation2 + $0xa10] sm:$0xf]  ;;  %v5340_v52 = vld [vmem:[#allocation2 + $0xa28] sm:$0xf0]  ;;  %v5057_v53 = vld [vmem:[#allocation2 + $0x154] sm:$0xf]  ;;  %v3866_v57 = vor.u32 %v5120_v44, %v3863_v45  ;;  %v4506_v58 = vor.u32 %v5284_v49, %v4505_v48 }
  0x2f   :  { %2291 = vmatpush.bf16.msra.mxu0 %v3470_v16  ;;  %v3611_v54 = vld [vmem:[#allocation2 + $0x16c] sm:$0xf0]  ;;  %v5113_v59 = vld [vmem:[#allocation2 + $0x314] sm:$0xf]  ;;  %v4730_v61 = vor.u32 %v5340_v52, %v4729_v50  ;;  %v4477_v63 = vld [vmem:[#allocation2 + $0x818] sm:$0xf] }
  0x30   :  { %2304 = vmatpush.bf16.msra.mxu1 %v3694_v20  ;;  %v3835_v60 = vld [vmem:[#allocation2 + $0x32c] sm:$0xf0]  ;;  %v3614_v62 = vor.u32 %v5057_v53, %v3611_v54  ;;  %v5277_v0 = vld [vmem:[#allocation2 + $0x830] sm:$0xf0]  ;;  %v4701_v1 = vld [vmem:[#allocation2 + $0x9d8] sm:$0xf] }
  0x31   :  { %2317 = vmatpush.bf16.msra.mxu2 %v3918_v21  ;;  %v5333_v2 = vld [vmem:[#allocation2 + $0x9f0] sm:$0xf0]  ;;  %v5050_v3 = vld [vmem:[#allocation2 + $0x11c] sm:$0xf]  ;;  %v3583_v4 = vld [vmem:[#allocation2 + $0x134] sm:$0xf0]  ;;  %v3838_v5 = vor.u32 %v5113_v59, %v3835_v60  ;;  %v4478_v6 = vor.u32 %v5277_v0, %v4477_v63 }
  0x32   :  { %2330 = vmatpush.bf16.msra.mxu3 %v4142_v25  ;;  %v5106_v7 = vld [vmem:[#allocation2 + $0x2dc] sm:$0xf]  ;;  %v3807_v8 = vld [vmem:[#allocation2 + $0x2f4] sm:$0xf0]  ;;  %v81_v9 = vld [vmem:[%s5742_s0] sm:$0xff]  ;;  %v4702_v10 = vor.u32 %v5333_v2, %v4701_v1  ;;  %v3586_v11 = vor.u32 %v5050_v3, %v3583_v4  ;;  %s3427_s24 = sshll.u32 %s5747_s5, 4  ;;  %s3428_s24 = int_to_ptr.hbm [resolvable:$true] %s3427_s24 }
  0x33   :  { %2292 = vmatpush.bf16.msra.mxu0 %v3442_v32  ;;  %v4449_v12 = vld [vmem:[#allocation2 + $0x7e0] sm:$0xf]  ;;  %v5270_v13 = vld [vmem:[#allocation2 + $0x7f8] sm:$0xf0]  ;;  %v497_v15 = vunpack.c.l.b16 %v81_v9  ;;  %v498_v16 = vunpack.c.h.b16 %v81_v9  ;;  %v5043_v18 = vld [vmem:[#allocation2 + $0xe4] sm:$0xf]  ;;  %v3810_v22 = vor.u32 %v5106_v7, %v3807_v8 }
  0x34   :  { %2305 = vmatpush.bf16.msra.mxu1 %v3666_v36  ;;  %v4673_v14 = vld [vmem:[#allocation2 + $0x9a0] sm:$0xf]  ;;  %v5326_v17 = vld [vmem:[#allocation2 + $0x9b8] sm:$0xf0]  ;;  %v4450_v23 = vor.u32 %v5270_v13, %v4449_v12  ;;  %v5099_v24 = vld [vmem:[#allocation2 + $0x2a4] sm:$0xf] }
  0x35   :  { %2318 = vmatpush.bf16.msra.mxu2 %v3890_v37  ;;  %v3555_v19 = vld [vmem:[#allocation2 + $0xfc] sm:$0xf0]  ;;  %v5609_v20 = vpack.c.b16 %v497_v15, %v497_v15  ;;  %v5611_v21 = vpack.c.b16 %v498_v16, %v498_v16  ;;  %v4674_v26 = vor.u32 %v5326_v17, %v4673_v14  ;;  %v4421_v28 = vld [vmem:[#allocation2 + $0x7a8] sm:$0xf]  ;;  %v5263_v29 = vld [vmem:[#allocation2 + $0x7c0] sm:$0xf0] }
  0x36   :  { %2331 = vmatpush.bf16.msra.mxu3 %v4114_v42  ;;  %v3779_v25 = vld [vmem:[#allocation2 + $0x2bc] sm:$0xf0]  ;;  %v3558_v27 = vor.u32 %v5043_v18, %v3555_v19  ;;  %v4645_v30 = vld [vmem:[#allocation2 + $0x968] sm:$0xf]  ;;  %v5319_v31 = vld [vmem:[#allocation2 + $0x980] sm:$0xf0]  ;;  %v4422_v35 = vor.u32 %v5263_v29, %v4421_v28 }
  0x37   :  { %2337 = vmatpush.bf16.msrb.mxu0 %v4534_v43  ;;  %v5036_v32 = vld [vmem:[#allocation2 + $0xac] sm:$0xf]  ;;  %v3527_v33 = vld [vmem:[#allocation2 + $0xc4] sm:$0xf0]  ;;  %2306 = vmatmul.bf16.vlgmr.msra.gmra.mxu1 %v5611_v21  ;;  %v3782_v34 = vor.u32 %v5099_v24, %v3779_v25  ;;  %v84_v38 = vld [vmem:[%s5742_s0 + $0x18] sm:$0xf]  ;;  %v4646_v39 = vor.u32 %v5319_v31, %v4645_v30 }
  0x38   :  { %2350 = vmatpush.bf16.msrb.mxu1 %v4758_v46  ;;  %2319 = vmatmul.bf16.vlgmr.msra.gmra.mxu2 %v5600_v55  ;;  %v5092_v36 = vld [vmem:[#allocation2 + $0x26c] sm:$0xf]  ;;  %v3751_v37 = vld [vmem:[#allocation2 + $0x284] sm:$0xf0]  ;;  %v3530_v40 = vor.u32 %v5036_v32, %v3527_v33  ;;  %v4393_v41 = vld [vmem:[#allocation2 + $0x770] sm:$0xf]  ;;  %v503_v44 = vunpack.c.l.b16 %v84_v38 }
  0x39   :  { %2370 = vmatpush.bf16.msrb.mxu2 %v4786_v51  ;;  %2332 = vmatmul.bf16.vlgmr.msra.gmra.mxu3 %v5602_v56  ;;  %v5256_v42 = vld [vmem:[#allocation2 + $0x788] sm:$0xf0]  ;;  %v4617_v43 = vld [vmem:[#allocation2 + $0x930] sm:$0xf]  ;;  %v5029_v46 = vld [vmem:[#allocation2 + $0x74] sm:$0xf]  ;;  %v3754_v49 = vor.u32 %v5092_v36, %v3751_v37 }
  0x3a   :  { %2376 = vmatpush.bf16.msrb.mxu3 %v3642_v47  ;;  %2293 = vmatmul.bf16.vlgmr.msra.gmra.mxu0 %v5609_v20  ;;  %v5312_v45 = vld [vmem:[#allocation2 + $0x948] sm:$0xf0]  ;;  %v3499_v47 = vld [vmem:[#allocation2 + $0x8c] sm:$0xf0]  ;;  %v5618_v48 = vpack.c.b16 %v503_v44, %v503_v44  ;;  %v4394_v50 = vor.u32 %v5256_v42, %v4393_v41  ;;  %v5085_v51 = vld [vmem:[#allocation2 + $0x234] sm:$0xf] }
  0x3b   :  { %2338 = vmatpush.bf16.msrb.mxu0 %v4506_v58  ;;  %v3723_v52 = vld [vmem:[#allocation2 + $0x24c] sm:$0xf0]  ;;  %v4618_v53 = vor.u32 %v5312_v45, %v4617_v43  ;;  %v3502_v54 = vor.u32 %v5029_v46, %v3499_v47  ;;  %v5249_v58 = vld [vmem:[#allocation2 + $0x750] sm:$0xf0]  ;;  %v4589_v59 = vld [vmem:[#allocation2 + $0x8f8] sm:$0xf] }
  0x3c   :  { %2351 = vmatpush.bf16.msrb.mxu1 %v4730_v61  ;;  %v5305_v60 = vld [vmem:[#allocation2 + $0x910] sm:$0xf0]  ;;  %v5022_v61 = vld [vmem:[#allocation2 + $0x3c] sm:$0xf]  ;;  %v3726_v0 = vor.u32 %v5085_v51, %v3723_v52  ;;  %v3695_v2 = vld [vmem:[#allocation2 + $0x214] sm:$0xf0] }
  0x3d   :  { %2389 = vmatpush.bf16.msra.mxu2 %v3866_v57  ;;  %v4365_v57 = vld [vmem:[#allocation2 + $0x738] sm:$0xf]  ;;  %v5078_v63 = vld [vmem:[#allocation2 + $0x1fc] sm:$0xf]  ;;  %v4337_v3 = vld [vmem:[#allocation2 + $0x700] sm:$0xf] }
  0x3e   :  { %2377 = vmatpush.bf16.msrb.mxu3 %v3614_v62  ;;  %v3471_v62 = vld [vmem:[#allocation2 + $0x54] sm:$0xf0]  ;;  %v4366_v1 = vor.u32 %v5249_v58, %v4365_v57  ;;  %v83_v4 = vld [vmem:[%s5742_s0 + $0x10] sm:$0xff]  ;;  %v5242_v7 = vld [vmem:[#allocation2 + $0x718] sm:$0xf0]  ;;  %v3698_v17 = vor.u32 %v5078_v63, %v3695_v2  ;;  %s5554_s0 = smov [#allocation10]  }
  0x3f   :  { %2339 = vmatpush.bf16.msrb.mxu0 %v4478_v6  ;;  %v3474_v6 = vor.u32 %v5022_v61, %v3471_v62  ;;  %v4561_v8 = vld [vmem:[#allocation2 + $0x8c0] sm:$0xf]  ;;  %v5298_v9 = vld [vmem:[#allocation2 + $0x8d8] sm:$0xf0]  ;;  %v5176_v12 = vld [vmem:[#allocation2 + $0x50c] sm:$0xf]  ;;  %v501_v16 = vunpack.c.l.b16 %v83_v4  ;;  %v4338_v18 = vor.u32 %v5242_v7, %v4337_v3 }
  0x40   :  { %2352 = vmatpush.bf16.msrb.mxu1 %v4702_v10  ;;  %v5015_v10 = vld [vmem:[#allocation2 + $0x4] sm:$0xf]  ;;  %v4087_v13 = vld [vmem:[#allocation2 + $0x524] sm:$0xf0]  ;;  %v5232_v14 = vld [vmem:[#allocation2 + $0x6cc] sm:$0xf] }
  0x41   :  { %2390 = vmatpush.bf16.msra.mxu2 %v3838_v5  ;;  %v4590_v5 = vor.u32 %v5305_v60, %v4589_v59  ;;  %v4311_v15 = vld [vmem:[#allocation2 + $0x6e4] sm:$0xf0]  ;;  %v5288_v19 = vld [vmem:[#allocation2 + $0x88c] sm:$0xf]  ;;  %v5071_v25 = vld [vmem:[#allocation2 + $0x1c4] sm:$0xf]  ;;  %v4090_v28 = vor.u32 %v5176_v12, %v4087_v13  ;;  %v5625_v37 = vpack.c.b16 %v501_v16, %v501_v16 }
  0x42   :  { %2378 = vmatpush.bf16.msrb.mxu3 %v3586_v11  ;;  %v3443_v11 = vld [vmem:[#allocation2 + $0x1c] sm:$0xf0]  ;;  %v4314_v29 = vor.u32 %v5232_v14, %v4311_v15  ;;  %v5344_v30 = vld [vmem:[#allocation2 + $0xa4c] sm:$0xf]  ;;  %v4759_v31 = vld [vmem:[#allocation2 + $0xa64] sm:$0xf0] }
  0x43   :  { %2340 = vmatpush.bf16.msrb.mxu0 %v4450_v23  ;;  %v4562_v23 = vor.u32 %v5298_v9, %v4561_v8  ;;  %v3446_v24 = vor.u32 %v5015_v10, %v3443_v11  ;;  %v5169_v32 = vld [vmem:[#allocation2 + $0x4d4] sm:$0xf]  ;;  %v4283_v36 = vld [vmem:[#allocation2 + $0x6ac] sm:$0xf0]  ;;  %v4762_v41 = vor.u32 %v5344_v30, %v4759_v31  ;;  %v5162_v47 = vld [vmem:[#allocation2 + $0x49c] sm:$0xf] }
  0x44   :  { %2353 = vmatpush.bf16.msrb.mxu1 %v4674_v26  ;;  %v3667_v26 = vld [vmem:[#allocation2 + $0x1dc] sm:$0xf0]  ;;  %v5337_v45 = vld [vmem:[#allocation2 + $0xa14] sm:$0xf]  ;;  %v4731_v46 = vld [vmem:[#allocation2 + $0xa2c] sm:$0xf0] }
  0x45   :  { %2391 = vmatpush.bf16.msra.mxu2 %v3810_v22  ;;  %v4535_v22 = vld [vmem:[#allocation2 + $0x8a4] sm:$0xf0]  ;;  %v3670_v38 = vor.u32 %v5071_v25, %v3667_v26  ;;  %v5218_v51 = vld [vmem:[#allocation2 + $0x65c] sm:$0xf]  ;;  %v4255_v52 = vld [vmem:[#allocation2 + $0x674] sm:$0xf0]  ;;  %v4734_v57 = vor.u32 %v5337_v45, %v4731_v46 }
  0x46   :  { %2379 = vmatpush.bf16.msrb.mxu3 %v3558_v27  ;;  %v502_v27 = vunpack.c.h.b16 %v83_v4  ;;  %v4538_v33 = vor.u32 %v5288_v19, %v4535_v22  ;;  %v4258_v59 = vor.u32 %v5218_v51, %v4255_v52  ;;  %v5330_v60 = vld [vmem:[#allocation2 + $0x9dc] sm:$0xf]  ;;  %v4703_v61 = vld [vmem:[#allocation2 + $0x9f4] sm:$0xf0]  ;;  %v5155_v62 = vld [vmem:[#allocation2 + $0x464] sm:$0xf] }
  0x47   :  { %2341 = vmatpush.bf16.msrb.mxu0 %v4422_v35  ;;  %v5225_v35 = vld [vmem:[#allocation2 + $0x694] sm:$0xf]  ;;  %v4227_v2 = vld [vmem:[#allocation2 + $0x63c] sm:$0xf0]  ;;  %v5267_v3 = vld [vmem:[#allocation2 + $0x7e4] sm:$0xf] }
  0x48   :  { %2354 = vmatpush.bf16.msrb.mxu1 %v4646_v39  ;;  %4811 = vmatmul.msk.bf16.vlgmr.msrb.gmra.mxu2 %vm2281_vm0, %v5618_v48  ;;  %v5281_v39 = vld [vmem:[#allocation2 + $0x854] sm:$0xf]  ;;  %v5627_v42 = vpack.c.b16 %v502_v27, %v502_v27  ;;  %v4286_v44 = vor.u32 %v5225_v35, %v4283_v36  ;;  %v4451_v4 = vld [vmem:[#allocation2 + $0x7fc] sm:$0xf0]  ;;  %v5323_v8 = vld [vmem:[#allocation2 + $0x9a4] sm:$0xf] }
  0x49   :  { %2392 = vmatpush.bf16.msra.mxu2 %v3782_v34  ;;  %v4059_v34 = vld [vmem:[#allocation2 + $0x4ec] sm:$0xf0]  ;;  %v4675_v9 = vld [vmem:[#allocation2 + $0x9bc] sm:$0xf0]  ;;  %v5148_v10 = vld [vmem:[#allocation2 + $0x42c] sm:$0xf]  ;;  %v4454_v11 = vor.u32 %v5267_v3, %v4451_v4 }
  0x4a   :  { %2380 = vmatpush.bf16.msrb.mxu3 %v3530_v40  ;;  %v4507_v40 = vld [vmem:[#allocation2 + $0x86c] sm:$0xf0]  ;;  %v4062_v43 = vor.u32 %v5169_v32, %v4059_v34  ;;  %v3975_v12 = vld [vmem:[#allocation2 + $0x444] sm:$0xf0]  ;;  %v5204_v13 = vld [vmem:[#allocation2 + $0x5ec] sm:$0xf] }
  0x4b   :  { %2342 = vmatpush.bf16.msrb.mxu0 %v4394_v50  ;;  %v4031_v50 = vld [vmem:[#allocation2 + $0x4b4] sm:$0xf0]  ;;  %v4199_v14 = vld [vmem:[#allocation2 + $0x604] sm:$0xf0]  ;;  %v5260_v15 = vld [vmem:[#allocation2 + $0x7ac] sm:$0xf] }
  0x4c   :  { %2355 = vmatpush.bf16.msrb.mxu1 %v4618_v53  ;;  %v5274_v53 = vld [vmem:[#allocation2 + $0x81c] sm:$0xf]  ;;  %v4034_v58 = vor.u32 %v5162_v47, %v4031_v50  ;;  %v4423_v16 = vld [vmem:[#allocation2 + $0x7c4] sm:$0xf0]  ;;  %v4202_v19 = vor.u32 %v5204_v13, %v4199_v14  ;;  %v5316_v22 = vld [vmem:[#allocation2 + $0x96c] sm:$0xf] }
  0x4d   :  { %2393 = vmatpush.bf16.msra.mxu2 %v3754_v49  ;;  %v4510_v49 = vor.u32 %v5281_v39, %v4507_v40  ;;  %v4426_v25 = vor.u32 %v5260_v15, %v4423_v16  ;;  %v3947_v26 = vld [vmem:[#allocation2 + $0x40c] sm:$0xf0]  ;;  %v5197_v27 = vld [vmem:[#allocation2 + $0x5b4] sm:$0xf]  ;;  %v5134_v36 = vld [vmem:[#allocation2 + $0x3bc] sm:$0xf] }
  0x4e   :  { %2381 = vmatpush.bf16.msrb.mxu3 %v3502_v54  ;;  %v4479_v54 = vld [vmem:[#allocation2 + $0x834] sm:$0xf0]  ;;  %v4395_v30 = vld [vmem:[#allocation2 + $0x78c] sm:$0xf0]  ;;  %v5309_v34 = vld [vmem:[#allocation2 + $0x934] sm:$0xf] }
  0x4f   :  { %2343 = vmatpush.bf16.msrb.mxu0 %v4366_v1  ;;  %v4482_v63 = vor.u32 %v5274_v53, %v4479_v54  ;;  %v5211_v1 = vld [vmem:[#allocation2 + $0x624] sm:$0xf]  ;;  %v4619_v35 = vld [vmem:[#allocation2 + $0x94c] sm:$0xf0]  ;;  %v3919_v39 = vld [vmem:[#allocation2 + $0x3d4] sm:$0xf0] }
  0x50   :  { %2356 = vmatpush.bf16.msrb.mxu1 %v4590_v5  ;;  %v4706_v5 = vor.u32 %v5330_v60, %v4703_v61  ;;  %v4230_v7 = vor.u32 %v5211_v1, %v4227_v2  ;;  %v5190_v40 = vld [vmem:[#allocation2 + $0x57c] sm:$0xf]  ;;  %v4622_v45 = vor.u32 %v5309_v34, %v4619_v35  ;;  %v4591_v47 = vld [vmem:[#allocation2 + $0x914] sm:$0xf0]  ;;  %v3922_v50 = vor.u32 %v5134_v36, %v3919_v39  ;;  %v3891_v52 = vld [vmem:[#allocation2 + $0x39c] sm:$0xf0] }
  0x51   :  { %2394 = vmatpush.bf16.msra.mxu2 %v3726_v0  ;;  %v4003_v0 = vld [vmem:[#allocation2 + $0x47c] sm:$0xf0]  ;;  %v5302_v46 = vld [vmem:[#allocation2 + $0x8fc] sm:$0xf]  ;;  %v5183_v53 = vld [vmem:[#allocation2 + $0x544] sm:$0xf] }
  0x52   :  { %2382 = vmatpush.bf16.msrb.mxu3 %v3474_v6  ;;  %v4006_v6 = vor.u32 %v5155_v62, %v4003_v0  ;;  %v4115_v54 = vld [vmem:[#allocation2 + $0x55c] sm:$0xf0]  ;;  %v3645_v60 = vld [vmem:[#allocation2 + $0x190] sm:$0xf]  ;;  %v5068_v61 = vld [vmem:[#allocation2 + $0x1a8] sm:$0xf0] }
  0x53   :  { %2344 = vmatpush.bf16.msrb.mxu0 %v4338_v18  ;;  %v3978_v18 = vor.u32 %v5148_v10, %v3975_v12  ;;  %v4093_v62 = vld [vmem:[#allocation2 + $0x510] sm:$0xf]  ;;  %v5180_v0 = vld [vmem:[#allocation2 + $0x528] sm:$0xf0]  ;;  %v5351_v1 = vld [vmem:[#allocation2 + $0xa84] sm:$0xf]  ;;  %v4118_v4 = vor.u32 %v5183_v53, %v4115_v54 }
  0x54   :  { %2357 = vmatpush.bf16.msrb.mxu1 %v4562_v23  ;;  %v4647_v23 = vld [vmem:[#allocation2 + $0x984] sm:$0xf0]  ;;  %v4787_v2 = vld [vmem:[#allocation2 + $0xa9c] sm:$0xf0]  ;;  %v5236_v10 = vld [vmem:[#allocation2 + $0x6e8] sm:$0xf0] }
  0x55   :  { %2395 = vmatpush.bf16.msra.mxu2 %v3698_v17  ;;  %v4678_v17 = vor.u32 %v5323_v8, %v4675_v9  ;;  %v4650_v31 = vor.u32 %v5316_v22, %v4647_v23  ;;  %v3646_v8 = vor.u32 %v5068_v61, %v3645_v60  ;;  %v4317_v9 = vld [vmem:[#allocation2 + $0x6d0] sm:$0xf]  ;;  %v4790_v12 = vor.u32 %v5351_v1, %v4787_v2  ;;  %v5124_v14 = vld [vmem:[#allocation2 + $0x368] sm:$0xf0]  ;;  %v3617_v15 = vld [vmem:[#allocation2 + $0x158] sm:$0xf] }
  0x56   :  { %2383 = vmatpush.bf16.msrb.mxu3 %v3446_v24  ;;  %2345 = vmatmul.bf16.vlgmr.msrb.gmra.mxu0 %v5625_v37  ;;  %v5141_v24 = vld [vmem:[#allocation2 + $0x3f4] sm:$0xf]  ;;  %v3869_v13 = vld [vmem:[#allocation2 + $0x350] sm:$0xf]  ;;  %v4318_v22 = vor.u32 %v5236_v10, %v4317_v9  ;;  %v4261_v36 = vld [vmem:[#allocation2 + $0x660] sm:$0xf] }
  0x57   :  { %2402 = vmatpush.bf16.msra.mxu0 %v4090_v28  ;;  %2358 = vmatmul.bf16.vlgmr.msrb.gmra.mxu1 %v5627_v42  ;;  %v4171_v28 = vld [vmem:[#allocation2 + $0x5cc] sm:$0xf0]  ;;  %v3950_v32 = vor.u32 %v5141_v24, %v3947_v26  ;;  %v3870_v23 = vor.u32 %v5124_v14, %v3869_v13  ;;  %v4289_v24 = vld [vmem:[#allocation2 + $0x698] sm:$0xf]  ;;  %v5040_v60 = vld [vmem:[#allocation2 + $0xc8] sm:$0xf0] }
  0x58   :  { %2415 = vmatpush.bf16.msra.mxu1 %v4314_v29  ;;  %v5253_v29 = vld [vmem:[#allocation2 + $0x774] sm:$0xf]  ;;  %v3981_v61 = vld [vmem:[#allocation2 + $0x430] sm:$0xf]  ;;  %v5208_v2 = vld [vmem:[#allocation2 + $0x608] sm:$0xf0] }
  0x59   :  { %2396 = vmatpush.bf16.msra.mxu2 %v3670_v38  ;;  %2384 = vmatmul.bf16.vlgmr.msrb.gmra.mxu3 %v5609_v20  ;;  %v4398_v38 = vor.u32 %v5253_v29, %v4395_v30  ;;  %v5117_v29 = vld [vmem:[#allocation2 + $0x330] sm:$0xf0]  ;;  %v3589_v30 = vld [vmem:[#allocation2 + $0x120] sm:$0xf]  ;;  %v4205_v1 = vld [vmem:[#allocation2 + $0x5f0] sm:$0xf] }
  0x5a   :  { %2428 = vmatpush.bf16.msra.mxu3 %v4538_v33  ;;  %v4174_v33 = vor.u32 %v5197_v27, %v4171_v28  ;;  %v3841_v28 = vld [vmem:[#allocation2 + $0x318] sm:$0xf]  ;;  %v5145_v10 = vld [vmem:[#allocation2 + $0x410] sm:$0xf0]  ;;  %s3425_s21 = sshll.u32 %s5554_s0, 4  ;;  %s3426_s21 = int_to_ptr.vmem [resolvable:$true] %s3425_s21 }
  0x5b   :  { %2403 = vmatpush.bf16.msra.mxu0 %v4062_v43  ;;  %v5246_v43 = vld [vmem:[#allocation2 + $0x73c] sm:$0xf]  ;;  %v3842_v35 = vor.u32 %v5117_v29, %v3841_v28  ;;  %v3953_v9 = vld [vmem:[#allocation2 + $0x3f8] sm:$0xf]  ;;  %v5201_v14 = vld [vmem:[#allocation2 + $0x5d0] sm:$0xf0] }
  0x5c   :  { %2416 = vmatpush.bf16.msra.mxu1 %v4286_v44  ;;  %2397 = vmatmul.bf16.vlgmr.msra.gmra.mxu2 %v5611_v21  ;;  %v4367_v44 = vld [vmem:[#allocation2 + $0x754] sm:$0xf0]  ;;  %v4149_v28 = vld [vmem:[#allocation2 + $0x580] sm:$0xf]  ;;  %v5194_v29 = vld [vmem:[#allocation2 + $0x598] sm:$0xf0] }
  0x5d   :  { %2441 = vmatpush.bf16.msrb.mxu2 %v4762_v41  ;;  %v4143_v41 = vld [vmem:[#allocation2 + $0x594] sm:$0xf0] }
  0x5e   :  { %2429 = vmatpush.bf16.msra.mxu3 %v4510_v49  ;;  %v5127_v49 = vld [vmem:[#allocation2 + $0x384] sm:$0xf]  ;;  %v4146_v51 = vor.u32 %v5190_v40, %v4143_v41  ;;  %v3813_v41 = vld [vmem:[#allocation2 + $0x2e0] sm:$0xf]  ;;  %v4177_v13 = vld [vmem:[#allocation2 + $0x5b8] sm:$0xf] }
  0x5f   :  { %2404 = vmatpush.bf16.msra.mxu0 %v4034_v58  ;;  %v5239_v58 = vld [vmem:[#allocation2 + $0x704] sm:$0xf]  ;;  %v3894_v3 = vor.u32 %v5127_v49, %v3891_v52 }
  0x60   :  { %2417 = vmatpush.bf16.msra.mxu1 %v4258_v59  ;;  %v4339_v59 = vld [vmem:[#allocation2 + $0x71c] sm:$0xf0]  ;;  %v5215_v52 = vld [vmem:[#allocation2 + $0x640] sm:$0xf0] }
  0x61   :  { %2442 = vmatpush.bf16.msrb.mxu2 %v4734_v57  ;;  %v4370_v57 = vor.u32 %v5246_v43, %v4367_v44  ;;  %v5110_v43 = vld [vmem:[#allocation2 + $0x2f8] sm:$0xf0]  ;;  %v3561_v44 = vld [vmem:[#allocation2 + $0xe8] sm:$0xf] }
  0x62   :  { %2430 = vmatpush.bf16.msra.mxu3 %v4482_v63  ;;  %v4594_v63 = vor.u32 %v5302_v46, %v4591_v47  ;;  %v4009_v46 = vld [vmem:[#allocation2 + $0x468] sm:$0xf]  ;;  %v5159_v47 = vld [vmem:[#allocation2 + $0x480] sm:$0xf0] }
  0x63   :  { %2405 = vmatpush.bf16.msra.mxu0 %v4006_v6  ;;  %v4563_v6 = vld [vmem:[#allocation2 + $0x8dc] sm:$0xf0]  ;;  %v4010_v54 = vor.u32 %v5159_v47, %v4009_v46  ;;  %v4121_v46 = vld [vmem:[#allocation2 + $0x548] sm:$0xf]  ;;  %v5187_v47 = vld [vmem:[#allocation2 + $0x560] sm:$0xf0] }
  0x64   :  { %2418 = vmatpush.bf16.msra.mxu1 %v4230_v7  ;;  %v4342_v7 = vor.u32 %v5239_v58, %v4339_v59  ;;  %v5103_v58 = vld [vmem:[#allocation2 + $0x2c0] sm:$0xf0]  ;;  %v3533_v59 = vld [vmem:[#allocation2 + $0xb0] sm:$0xf] }
  0x65   :  { %2443 = vmatpush.bf16.msrb.mxu2 %v4706_v5  ;;  %v5295_v5 = vld [vmem:[#allocation2 + $0x8c4] sm:$0xf] }
  0x66   :  { %2431 = vmatpush.bf16.msra.mxu3 %v4454_v11  ;;  %v4094_v11 = vor.u32 %v5180_v0, %v4093_v62  ;;  %v4566_v16 = vor.u32 %v5295_v5, %v4563_v6  ;;  %v5152_v62 = vld [vmem:[#allocation2 + $0x448] sm:$0xf0]  ;;  %v3757_v5 = vld [vmem:[#allocation2 + $0x270] sm:$0xf] }
  0x67   :  { %2406 = vmatpush.bf16.msra.mxu0 %v3978_v18  ;;  %v4065_v18 = vld [vmem:[#allocation2 + $0x4d8] sm:$0xf]  ;;  %v5096_v6 = vld [vmem:[#allocation2 + $0x288] sm:$0xf0] }
  0x68   :  { %2419 = vmatpush.bf16.msra.mxu1 %v4202_v19  ;;  %v5173_v19 = vld [vmem:[#allocation2 + $0x4f0] sm:$0xf0] }
  0x69   :  { %2444 = vmatpush.bf16.msrb.mxu2 %v4678_v17  ;;  %v5061_v17 = vld [vmem:[#allocation2 + $0x170] sm:$0xf0]  ;;  %v4066_v27 = vor.u32 %v5173_v19, %v4065_v18  ;;  %v3477_v19 = vld [vmem:[#allocation2 + $0x40] sm:$0xf] }
  0x6a   :  { %2432 = vmatpush.bf16.msra.mxu3 %v4426_v25  ;;  %v5229_v25 = vld [vmem:[#allocation2 + $0x6b0] sm:$0xf0]  ;;  %v3618_v26 = vor.u32 %v5061_v17, %v3617_v15  ;;  %v3729_v17 = vld [vmem:[#allocation2 + $0x238] sm:$0xf] }
  0x6b   :  { %2407 = vmatpush.bf16.msra.mxu0 %v3950_v32  ;;  %v4037_v32 = vld [vmem:[#allocation2 + $0x4a0] sm:$0xf]  ;;  %v4290_v34 = vor.u32 %v5229_v25, %v4289_v24  ;;  %v5089_v18 = vld [vmem:[#allocation2 + $0x250] sm:$0xf0]  ;;  %v5138_v24 = vld [vmem:[#allocation2 + $0x3d8] sm:$0xf0]  ;;  %v4178_v25 = vor.u32 %v5201_v14, %v4177_v13 }
  0x6c   :  { %2420 = vmatpush.bf16.msra.mxu1 %v4174_v33  ;;  %v5166_v33 = vld [vmem:[#allocation2 + $0x4b8] sm:$0xf0] }
  0x6d   :  { %2445 = vmatpush.bf16.msrb.mxu2 %v4650_v31  ;;  %v5054_v31 = vld [vmem:[#allocation2 + $0x138] sm:$0xf0]  ;;  %v4038_v40 = vor.u32 %v5166_v33, %v4037_v32  ;;  %v3449_v33 = vld [vmem:[#allocation2 + $0x8] sm:$0xf] }
  0x6e   :  { %2433 = vmatpush.bf16.msra.mxu3 %v4398_v38  ;;  %v5222_v38 = vld [vmem:[#allocation2 + $0x678] sm:$0xf0]  ;;  %v3590_v39 = vor.u32 %v5054_v31, %v3589_v30 }
  0x6f   :  { %2408 = vmatpush.bf16.msra.mxu0 %v3922_v50  ;;  %v4262_v49 = vor.u32 %v5222_v38, %v4261_v36  ;;  %v3814_v50 = vor.u32 %v5110_v43, %v3813_v41  ;;  %v5082_v32 = vld [vmem:[#allocation2 + $0x218] sm:$0xf0]  ;;  %v5131_v36 = vld [vmem:[#allocation2 + $0x3a0] sm:$0xf0]  ;;  %v4541_v38 = vld [vmem:[#allocation2 + $0x890] sm:$0xf] }
  0x70   :  { %2421 = vmatpush.bf16.msra.mxu1 %v4146_v51  ;;  %v4233_v51 = vld [vmem:[#allocation2 + $0x628] sm:$0xf]  ;;  %v5355_v43 = vld [vmem:[#allocation2 + $0xaa0] sm:$0xf0]  ;;  %v5278_v13 = vld [vmem:[#allocation2 + $0x838] sm:$0xf0] }
  0x71   :  { %2446 = vmatpush.bf16.msrb.mxu2 %v4622_v45  ;;  %v5047_v45 = vld [vmem:[#allocation2 + $0x100] sm:$0xf0]  ;;  %v4793_v41 = vld [vmem:[#allocation2 + $0xa88] sm:$0xf] }
  0x72   :  { %2434 = vmatpush.bf16.msra.mxu3 %v4370_v57  ;;  %v3562_v53 = vor.u32 %v5047_v45, %v3561_v44  ;;  %v3785_v57 = vld [vmem:[#allocation2 + $0x2a8] sm:$0xf] }
  0x73   :  { %2409 = vmatpush.bf16.msra.mxu0 %v3894_v3  ;;  %v3786_v0 = vor.u32 %v5103_v58, %v3785_v57  ;;  %v3534_v3 = vor.u32 %v5040_v60, %v3533_v59  ;;  %v3673_v45 = vld [vmem:[#allocation2 + $0x1c8] sm:$0xf]  ;;  %v4794_v57 = vor.u32 %v5355_v43, %v4793_v41  ;;  %v5065_v58 = vld [vmem:[#allocation2 + $0x194] sm:$0xf]  ;;  %v3647_v59 = vld [vmem:[#allocation2 + $0x1ac] sm:$0xf0] }
  0x74   :  { %2422 = vmatpush.bf16.msra.mxu1 %v4118_v4  ;;  %v3982_v4 = vor.u32 %v5152_v62, %v3981_v61  ;;  %v5121_v60 = vld [vmem:[#allocation2 + $0x354] sm:$0xf]  ;;  %v4122_v61 = vor.u32 %v5187_v47, %v4121_v46  ;;  %v3871_v62 = vld [vmem:[#allocation2 + $0x36c] sm:$0xf0] }
  0x75   :  { %2447 = vmatpush.bf16.msrb.mxu2 %v4594_v63  ;;  %v4234_v63 = vor.u32 %v5215_v52, %v4233_v51  ;;  %v5075_v51 = vld [vmem:[#allocation2 + $0x1e0] sm:$0xf0]  ;;  %v4765_v52 = vld [vmem:[#allocation2 + $0xa50] sm:$0xf] }
  0x76   :  { %2435 = vmatpush.bf16.msra.mxu3 %v4342_v7  ;;  %2410 = vmatmul.bf16.vlgmr.msra.gmra.mxu0 %v5600_v55  ;;  %v3505_v7 = vld [vmem:[#allocation2 + $0x78] sm:$0xf] }
  0x77   :  { %2493 = vmatpush.bf16.msrb.mxu0 %v4094_v11  ;;  %2423 = vmatmul.bf16.vlgmr.msra.gmra.mxu1 %v5602_v56  ;;  %v4206_v11 = vor.u32 %v5208_v2, %v4205_v1  ;;  %v3674_v1 = vor.u32 %v5075_v51, %v3673_v45  ;;  %v5320_v45 = vld [vmem:[#allocation2 + $0x988] sm:$0xf0]  ;;  %v5093_v51 = vld [vmem:[#allocation2 + $0x274] sm:$0xf] }
  0x78   :  { %2467 = vmatpush.bf16.msrb.mxu1 %v3646_v8  ;;  %v5033_v8 = vld [vmem:[#allocation2 + $0x90] sm:$0xf0] }
  0x79   :  { %2448 = vmatpush.bf16.msrb.mxu2 %v4566_v16  ;;  %2436 = vmatmul.bf16.vlgmr.msra.gmra.mxu3 %v5625_v37  ;;  %v3506_v15 = vor.u32 %v5033_v8, %v3505_v7  ;;  %v3954_v16 = vor.u32 %v5145_v10, %v3953_v9  ;;  %v5058_v8 = vld [vmem:[#allocation2 + $0x15c] sm:$0xf]  ;;  %v3619_v9 = vld [vmem:[#allocation2 + $0x174] sm:$0xf0] }
  0x7a   :  { %2461 = vmatpush.bf16.msrb.mxu3 %v4790_v12  ;;  %v3758_v12 = vor.u32 %v5096_v6, %v3757_v5  ;;  %v5341_v5 = vld [vmem:[#allocation2 + $0xa30] sm:$0xf0]  ;;  %v3874_v6 = vor.u32 %v5121_v60, %v3871_v62  ;;  %v5114_v10 = vld [vmem:[#allocation2 + $0x31c] sm:$0xf] }
  0x7b   :  { %2494 = vmatpush.bf16.msrb.mxu0 %v4066_v27  ;;  %v3701_v27 = vld [vmem:[#allocation2 + $0x200] sm:$0xf]  ;;  %v5313_v60 = vld [vmem:[#allocation2 + $0x950] sm:$0xf0] }
  0x7c   :  { %2468 = vmatpush.bf16.msrb.mxu1 %v3618_v26  ;;  %2449 = vmatmul.bf16.vlgmr.msrb.gmra.mxu2 %v5627_v42  ;;  %v3730_v26 = vor.u32 %v5089_v18, %v3729_v17  ;;  %v3702_v44 = vor.u32 %v5082_v32, %v3701_v27  ;;  %v5334_v17 = vld [vmem:[#allocation2 + $0x9f8] sm:$0xf0]  ;;  %v5271_v27 = vld [vmem:[#allocation2 + $0x800] sm:$0xf0] }
  0x7d   :  { %2506 = vmatpush.bf16.msra.mxu2 %v4318_v22  ;;  %v5026_v22 = vld [vmem:[#allocation2 + $0x58] sm:$0xf0] }
  0x7e   :  { %2480 = vmatpush.bf16.msra.mxu3 %v3870_v23  ;;  %v3925_v23 = vld [vmem:[#allocation2 + $0x3c0] sm:$0xf]  ;;  %v3478_v30 = vor.u32 %v5026_v22, %v3477_v19  ;;  %v5051_v22 = vld [vmem:[#allocation2 + $0x124] sm:$0xf] }
  0x7f   :  { %2495 = vmatpush.bf16.msrb.mxu0 %v4038_v40  ;;  %v3926_v31 = vor.u32 %v5138_v24, %v3925_v23  ;;  %v5292_v40 = vld [vmem:[#allocation2 + $0x8a8] sm:$0xf0]  ;;  %v3591_v23 = vld [vmem:[#allocation2 + $0x13c] sm:$0xf0]  ;;  %v5107_v24 = vld [vmem:[#allocation2 + $0x2e4] sm:$0xf] }
  0x80   :  { %2469 = vmatpush.bf16.msrb.mxu1 %v3590_v39  ;;  %v4150_v39 = vor.u32 %v5194_v29, %v4149_v28  ;;  %v3594_v29 = vor.u32 %v5051_v22, %v3591_v23  ;;  %v4569_v23 = vld [vmem:[#allocation2 + $0x8c8] sm:$0xf] }
  0x81   :  { %2507 = vmatpush.bf16.msra.mxu2 %v4290_v34  ;;  %v5019_v34 = vld [vmem:[#allocation2 + $0x20] sm:$0xf0] }
  0x82   :  { %2481 = vmatpush.bf16.msra.mxu3 %v3842_v35  ;;  %v3897_v35 = vld [vmem:[#allocation2 + $0x388] sm:$0xf] }
  0x83   :  { %2496 = vmatpush.bf16.msrb.mxu0 %v4010_v54  ;;  %v4542_v54 = vor.u32 %v5292_v40, %v4541_v38  ;;  %v3787_v38 = vld [vmem:[#allocation2 + $0x2c4] sm:$0xf0]  ;;  %v5264_v40 = vld [vmem:[#allocation2 + $0x7c8] sm:$0xf0] }
  0x84   :  { %2470 = vmatpush.bf16.msrb.mxu1 %v3562_v53  ;;  %v5348_v53 = vld [vmem:[#allocation2 + $0xa68] sm:$0xf0] }
  0x85   :  { %2508 = vmatpush.bf16.msra.mxu2 %v4262_v49  ;;  %v3450_v49 = vor.u32 %v5019_v34, %v3449_v33  ;;  %v4766_v2 = vor.u32 %v5348_v53, %v4765_v52  ;;  %v5044_v34 = vld [vmem:[#allocation2 + $0xec] sm:$0xf]  ;;  %v3759_v52 = vld [vmem:[#allocation2 + $0x28c] sm:$0xf0]  ;;  %v4401_v53 = vld [vmem:[#allocation2 + $0x778] sm:$0xf] }
  0x86   :  { %2482 = vmatpush.bf16.msra.mxu3 %v3814_v50  ;;  %v3898_v50 = vor.u32 %v5131_v36, %v3897_v35  ;;  %v3563_v35 = vld [vmem:[#allocation2 + $0x104] sm:$0xf0]  ;;  %v5100_v36 = vld [vmem:[#allocation2 + $0x2ac] sm:$0xf] }
  0x87   :  { %2497 = vmatpush.bf16.msrb.mxu0 %v3982_v4  ;;  %v4737_v4 = vld [vmem:[#allocation2 + $0xa18] sm:$0xf]  ;;  %v3566_v43 = vor.u32 %v5044_v34, %v3563_v35  ;;  %v3790_v46 = vor.u32 %v5100_v36, %v3787_v38  ;;  %v5289_v34 = vld [vmem:[#allocation2 + $0x894] sm:$0xf]  ;;  %v4543_v35 = vld [vmem:[#allocation2 + $0x8ac] sm:$0xf0] }
  0x88   :  { %2471 = vmatpush.bf16.msrb.mxu1 %v3534_v3  ;;  %v3650_v3 = vor.u32 %v5065_v58, %v3647_v59  ;;  %v4738_v14 = vor.u32 %v5341_v5, %v4737_v4  ;;  %v4625_v59 = vld [vmem:[#allocation2 + $0x938] sm:$0xf]  ;;  %v5250_v4 = vld [vmem:[#allocation2 + $0x758] sm:$0xf0]  ;;  %v5345_v36 = vld [vmem:[#allocation2 + $0xa54] sm:$0xf] }
  0x89   :  { %2509 = vmatpush.bf16.msra.mxu2 %v4234_v63  ;;  %4812 = vmatmul.msk.bf16.vlgmr.msrb.gmra.mxu3 %vm2281_vm0, %v5618_v48  ;;  %v4513_v63 = vld [vmem:[#allocation2 + $0x858] sm:$0xf]  ;;  %v4626_v5 = vor.u32 %v5313_v60, %v4625_v59  ;;  %v4039_v59 = vld [vmem:[#allocation2 + $0x4bc] sm:$0xf0] }
  0x8a   :  { %2483 = vmatpush.bf16.msra.mxu3 %v3786_v0  ;;  %v5285_v0 = vld [vmem:[#allocation2 + $0x870] sm:$0xf0] }
  0x8b   :  { %2498 = vmatpush.bf16.msrb.mxu0 %v3954_v16  ;;  %v4514_v7 = vor.u32 %v5285_v0, %v4513_v63  ;;  %v4709_v16 = vld [vmem:[#allocation2 + $0x9e0] sm:$0xf]  ;;  %v5030_v63 = vld [vmem:[#allocation2 + $0x7c] sm:$0xf]  ;;  %v3507_v0 = vld [vmem:[#allocation2 + $0x94] sm:$0xf0] }
  0x8c   :  { %2472 = vmatpush.bf16.msrb.mxu1 %v3506_v15  ;;  %v3622_v15 = vor.u32 %v5058_v8, %v3619_v9  ;;  %v4710_v28 = vor.u32 %v5334_v17, %v4709_v16  ;;  %v5306_v8 = vld [vmem:[#allocation2 + $0x918] sm:$0xf0]  ;;  %v5243_v16 = vld [vmem:[#allocation2 + $0x720] sm:$0xf0]  ;;  %v5177_v17 = vld [vmem:[#allocation2 + $0x514] sm:$0xf] }
  0x8d   :  { %2510 = vmatpush.bf16.msra.mxu2 %v4206_v11  ;;  %v3843_v11 = vld [vmem:[#allocation2 + $0x334] sm:$0xf0] }
  0x8e   :  { %2484 = vmatpush.bf16.msra.mxu3 %v3758_v12  ;;  %v4485_v12 = vld [vmem:[#allocation2 + $0x820] sm:$0xf]  ;;  %v3846_v18 = vor.u32 %v5114_v10, %v3843_v11  ;;  %v5023_v11 = vld [vmem:[#allocation2 + $0x44] sm:$0xf] }
  0x8f   :  { %2499 = vmatpush.bf16.msrb.mxu0 %v3926_v31  ;;  %v4486_v19 = vor.u32 %v5278_v13, %v4485_v12  ;;  %v5327_v31 = vld [vmem:[#allocation2 + $0x9c0] sm:$0xf0]  ;;  %v3479_v12 = vld [vmem:[#allocation2 + $0x5c] sm:$0xf0] }
  0x90   :  { %2473 = vmatpush.bf16.msrb.mxu1 %v3478_v30  ;;  %v4681_v30 = vld [vmem:[#allocation2 + $0x9a8] sm:$0xf]  ;;  %v5079_v13 = vld [vmem:[#allocation2 + $0x204] sm:$0xf]  ;;  %v3482_v22 = vor.u32 %v5023_v11, %v3479_v12 }
  0x91   :  { %2511 = vmatpush.bf16.msra.mxu2 %v4178_v25  ;;  %v3815_v25 = vld [vmem:[#allocation2 + $0x2fc] sm:$0xf0]  ;;  %v4682_v41 = vor.u32 %v5327_v31, %v4681_v30  ;;  %v3675_v31 = vld [vmem:[#allocation2 + $0x1e4] sm:$0xf0] }
  0x92   :  { %2485 = vmatpush.bf16.msra.mxu3 %v3730_v26  ;;  %v4457_v26 = vld [vmem:[#allocation2 + $0x7e8] sm:$0xf]  ;;  %v3818_v32 = vor.u32 %v5107_v24, %v3815_v25  ;;  %v5299_v24 = vld [vmem:[#allocation2 + $0x8e0] sm:$0xf0] }
  0x93   :  { %2500 = vmatpush.bf16.msrb.mxu0 %v3898_v50  ;;  %v4458_v33 = vor.u32 %v5271_v27, %v4457_v26  ;;  %v3535_v50 = vld [vmem:[#allocation2 + $0xcc] sm:$0xf0]  ;;  %v5016_v27 = vld [vmem:[#allocation2 + $0xc] sm:$0xf]  ;;  %v4570_v38 = vor.u32 %v5299_v24, %v4569_v23  ;;  %v4235_v11 = vld [vmem:[#allocation2 + $0x644] sm:$0xf0] }
  0x94   :  { %2474 = vmatpush.bf16.msrb.mxu1 %v3450_v49  ;;  %v5037_v49 = vld [vmem:[#allocation2 + $0xb4] sm:$0xf] }
  0x95   :  { %2512 = vmatpush.bf16.msra.mxu2 %v4150_v39  ;;  %v4429_v39 = vld [vmem:[#allocation2 + $0x7b0] sm:$0xf]  ;;  %v3538_v58 = vor.u32 %v5037_v49, %v3535_v50  ;;  %v4291_v49 = vld [vmem:[#allocation2 + $0x6b4] sm:$0xf0] }
  0x96   :  { %2486 = vmatpush.bf16.msra.mxu3 %v3702_v44  ;;  %2501 = vmatmul.bf16.vlgmr.msrb.gmra.mxu0 %v5600_v55  ;;  %v4653_v44 = vld [vmem:[#allocation2 + $0x970] sm:$0xf]  ;;  %v4430_v47 = vor.u32 %v5264_v40, %v4429_v39  ;;  %v5170_v40 = vld [vmem:[#allocation2 + $0x4dc] sm:$0xf] }
  0x97   :  { %2552 = vmatpush.bf16.msra.mxu0 %v4794_v57  ;;  %2475 = vmatmul.bf16.vlgmr.msrb.gmra.mxu1 %v5609_v20  ;;  %v4654_v57 = vor.u32 %v5320_v45, %v4653_v44  ;;  %v4767_v39 = vld [vmem:[#allocation2 + $0xa6c] sm:$0xf0] }
  0x98   :  { %2519 = vmatpush.bf16.msra.mxu1 %v4542_v54  ;;  %v5257_v54 = vld [vmem:[#allocation2 + $0x790] sm:$0xf0]  ;;  %v4770_v50 = vor.u32 %v5345_v36, %v4767_v39  ;;  %v5198_v39 = vld [vmem:[#allocation2 + $0x5bc] sm:$0xf] }
  0x99   :  { %2513 = vmatpush.bf16.msra.mxu2 %v4122_v61  ;;  %v3762_v61 = vor.u32 %v5093_v51, %v3759_v52  ;;  %v4402_v62 = vor.u32 %v5257_v54, %v4401_v53  ;;  %v5282_v52 = vld [vmem:[#allocation2 + $0x85c] sm:$0xf]  ;;  %v4515_v53 = vld [vmem:[#allocation2 + $0x874] sm:$0xf0] }
  0x9a   :  { %2487 = vmatpush.bf16.msra.mxu3 %v3674_v1  ;;  %v5086_v1 = vld [vmem:[#allocation2 + $0x23c] sm:$0xf] }
  0x9b   :  { %2571 = vmatpush.bf16.msrb.mxu0 %v3874_v6  ;;  %v3510_v6 = vor.u32 %v5030_v63, %v3507_v0  ;;  %v5338_v54 = vld [vmem:[#allocation2 + $0xa1c] sm:$0xf]  ;;  %v4263_v63 = vld [vmem:[#allocation2 + $0x67c] sm:$0xf0] }
  0x9c   :  { %2520 = vmatpush.bf16.msra.mxu1 %v4514_v7  ;;  %2514 = vmatmul.bf16.vlgmr.msra.gmra.mxu2 %v5602_v56  ;;  %v4597_v7 = vld [vmem:[#allocation2 + $0x900] sm:$0xf] }
  0x9d   :  { %2558 = vmatpush.bf16.msrb.mxu2 %v3650_v3  ;;  %2488 = vmatmul.bf16.vlgmr.msra.gmra.mxu3 %v5611_v21  ;;  %v4373_v3 = vld [vmem:[#allocation2 + $0x740] sm:$0xf] }
  0x9e   :  { %2532 = vmatpush.bf16.msrb.mxu3 %v4766_v2  ;;  %v3731_v2 = vld [vmem:[#allocation2 + $0x254] sm:$0xf0]  ;;  %v4374_v10 = vor.u32 %v5250_v4, %v4373_v3  ;;  %v4487_v3 = vld [vmem:[#allocation2 + $0x83c] sm:$0xf0]  ;;  %v5331_v4 = vld [vmem:[#allocation2 + $0x9e4] sm:$0xf] }
  0x9f   :  { %2572 = vmatpush.bf16.msrb.mxu0 %v3846_v18  ;;  %v3734_v9 = vor.u32 %v5086_v1, %v3731_v2  ;;  %v4095_v18 = vld [vmem:[#allocation2 + $0x52c] sm:$0xf0]  ;;  %v5275_v2 = vld [vmem:[#allocation2 + $0x824] sm:$0xf] }
  0xa0   :  { %2521 = vmatpush.bf16.msra.mxu1 %v4486_v19  ;;  %v4598_v19 = vor.u32 %v5306_v8, %v4597_v7  ;;  %v4098_v30 = vor.u32 %v5177_v17, %v4095_v18  ;;  %v4011_v7 = vld [vmem:[#allocation2 + $0x484] sm:$0xf0]  ;;  %v5149_v18 = vld [vmem:[#allocation2 + $0x434] sm:$0xf] }
  0xa1   :  { %2559 = vmatpush.bf16.msrb.mxu2 %v3622_v15  ;;  %v4345_v15 = vld [vmem:[#allocation2 + $0x708] sm:$0xf] }
  0xa2   :  { %2533 = vmatpush.bf16.msrb.mxu3 %v4738_v14  ;;  %v3703_v14 = vld [vmem:[#allocation2 + $0x21c] sm:$0xf0]  ;;  %v4346_v26 = vor.u32 %v5243_v16, %v4345_v15  ;;  %v4459_v15 = vld [vmem:[#allocation2 + $0x804] sm:$0xf0]  ;;  %v5324_v16 = vld [vmem:[#allocation2 + $0x9ac] sm:$0xf] }
  0xa3   :  { %2573 = vmatpush.bf16.msrb.mxu0 %v3818_v32  ;;  %v3706_v25 = vor.u32 %v5079_v13, %v3703_v14  ;;  %v5233_v32 = vld [vmem:[#allocation2 + $0x6d4] sm:$0xf]  ;;  %v5268_v14 = vld [vmem:[#allocation2 + $0x7ec] sm:$0xf]  ;;  %v4683_v17 = vld [vmem:[#allocation2 + $0x9c4] sm:$0xf0] }
  0xa4   :  { %2522 = vmatpush.bf16.msra.mxu1 %v4458_v33  ;;  %v4319_v33 = vld [vmem:[#allocation2 + $0x6ec] sm:$0xf0]  ;;  %v4462_v24 = vor.u32 %v5268_v14, %v4459_v15 }
  0xa5   :  { %2560 = vmatpush.bf16.msrb.mxu2 %v3594_v29  ;;  %v5072_v29 = vld [vmem:[#allocation2 + $0x1cc] sm:$0xf]  ;;  %v4322_v45 = vor.u32 %v5233_v32, %v4319_v33  ;;  %v4655_v32 = vld [vmem:[#allocation2 + $0x98c] sm:$0xf0]  ;;  %v5142_v33 = vld [vmem:[#allocation2 + $0x3fc] sm:$0xf] }
  0xa6   :  { %2534 = vmatpush.bf16.msrb.mxu3 %v4710_v28  ;;  %4813 = vmatmul.msk.bf16.vlgmr.msra.gmra.mxu0 %vm2281_vm0, %v5618_v48  ;;  %v3451_v28 = vld [vmem:[#allocation2 + $0x24] sm:$0xf0]  ;;  %v3678_v44 = vor.u32 %v5072_v29, %v3675_v31  ;;  %v5317_v31 = vld [vmem:[#allocation2 + $0x974] sm:$0xf] }
  0xa7   :  { %2574 = vmatpush.bf16.msrb.mxu0 %v3790_v46  ;;  %v4546_v46 = vor.u32 %v5289_v34, %v4543_v35  ;;  %v3955_v34 = vld [vmem:[#allocation2 + $0x414] sm:$0xf0] }
  0xa8   :  { %2523 = vmatpush.bf16.msra.mxu1 %v4430_v47  ;;  %v5226_v47 = vld [vmem:[#allocation2 + $0x69c] sm:$0xf] }
  0xa9   :  { %2561 = vmatpush.bf16.msrb.mxu2 %v3566_v43  ;;  %v3454_v43 = vor.u32 %v5016_v27, %v3451_v28  ;;  %v4294_v60 = vor.u32 %v5226_v47, %v4291_v49  ;;  %v5261_v27 = vld [vmem:[#allocation2 + $0x7b4] sm:$0xf]  ;;  %v4686_v28 = vor.u32 %v5324_v16, %v4683_v17  ;;  %v4403_v47 = vld [vmem:[#allocation2 + $0x794] sm:$0xf0]  ;;  %v5310_v49 = vld [vmem:[#allocation2 + $0x93c] sm:$0xf] }
  0xaa   :  { %2535 = vmatpush.bf16.msrb.mxu3 %v4682_v41  ;;  %v4067_v41 = vld [vmem:[#allocation2 + $0x4f4] sm:$0xf0] }
  0xab   :  { %2575 = vmatpush.bf16.msrb.mxu0 %v3762_v61  ;;  %v4070_v51 = vor.u32 %v5170_v40, %v4067_v41  ;;  %v4518_v61 = vor.u32 %v5282_v52, %v4515_v53  ;;  %v4179_v40 = vld [vmem:[#allocation2 + $0x5d4] sm:$0xf0]  ;;  %v5135_v53 = vld [vmem:[#allocation2 + $0x3c4] sm:$0xf] }
  0xac   :  { %2524 = vmatpush.bf16.msra.mxu1 %v4402_v62  ;;  %v5219_v62 = vld [vmem:[#allocation2 + $0x664] sm:$0xf]  ;;  %v4627_v52 = vld [vmem:[#allocation2 + $0x954] sm:$0xf0] }
  0xad   :  { %2562 = vmatpush.bf16.msrb.mxu2 %v3538_v58  ;;  %v5163_v58 = vld [vmem:[#allocation2 + $0x4a4] sm:$0xf]  ;;  %v4266_v8 = vor.u32 %v5219_v62, %v4263_v63  ;;  %v4630_v63 = vor.u32 %v5310_v49, %v4627_v52  ;;  %v3849_v49 = vld [vmem:[#allocation2 + $0x320] sm:$0xf]  ;;  %v5174_v52 = vld [vmem:[#allocation2 + $0x4f8] sm:$0xf0] }
  0xae   :  { %2536 = vmatpush.bf16.msrb.mxu3 %v4654_v57  ;;  %v4739_v57 = vld [vmem:[#allocation2 + $0xa34] sm:$0xf0]  ;;  %v4042_v1 = vor.u32 %v5163_v58, %v4039_v59  ;;  %v4182_v58 = vor.u32 %v5198_v39, %v4179_v40 }
  0xaf   :  { %2576 = vmatpush.bf16.msrb.mxu0 %v3734_v9  ;;  %v4742_v0 = vor.u32 %v5338_v54, %v4739_v57  ;;  %v4490_v9 = vor.u32 %v5275_v2, %v4487_v3  ;;  %v3927_v54 = vld [vmem:[#allocation2 + $0x3dc] sm:$0xf0]  ;;  %v5303_v3 = vld [vmem:[#allocation2 + $0x904] sm:$0xf] }
  0xb0   :  { %2525 = vmatpush.bf16.msra.mxu1 %v4374_v10  ;;  %v5212_v10 = vld [vmem:[#allocation2 + $0x62c] sm:$0xf]  ;;  %v4375_v2 = vld [vmem:[#allocation2 + $0x75c] sm:$0xf0] }
  0xb1   :  { %2563 = vmatpush.bf16.msrb.mxu2 %v3510_v6  ;;  %v5156_v6 = vld [vmem:[#allocation2 + $0x46c] sm:$0xf]  ;;  %v4238_v23 = vor.u32 %v5212_v10, %v4235_v11 }
  0xb2   :  { %2537 = vmatpush.bf16.msrb.mxu3 %v4626_v5  ;;  %v4711_v5 = vld [vmem:[#allocation2 + $0x9fc] sm:$0xf0]  ;;  %v4014_v13 = vor.u32 %v5156_v6, %v4011_v7  ;;  %v3899_v6 = vld [vmem:[#allocation2 + $0x3a4] sm:$0xf0] }
  0xb3   :  { %2577 = vmatpush.bf16.msrb.mxu0 %v3706_v25  ;;  %v4714_v12 = vor.u32 %v5331_v4, %v4711_v5  ;;  %v5205_v25 = vld [vmem:[#allocation2 + $0x5f4] sm:$0xf]  ;;  %v4599_v4 = vld [vmem:[#allocation2 + $0x91c] sm:$0xf0]  ;;  %v5128_v5 = vld [vmem:[#allocation2 + $0x38c] sm:$0xf] }
  0xb4   :  { %2526 = vmatpush.bf16.msra.mxu1 %v4346_v26  ;;  %v4207_v26 = vld [vmem:[#allocation2 + $0x60c] sm:$0xf0]  ;;  %v4602_v17 = vor.u32 %v5303_v3, %v4599_v4  ;;  %v5167_v3 = vld [vmem:[#allocation2 + $0x4c0] sm:$0xf0]  ;;  %v4269_v4 = vld [vmem:[#allocation2 + $0x668] sm:$0xf] }
  0xb5   :  { %2564 = vmatpush.bf16.msrb.mxu2 %v3482_v22  ;;  %v5649_v22 = vld [vmem:[#allocation5] sm:$0x7f]  ;;  %v4210_v36 = vor.u32 %v5205_v25, %v4207_v26 }
  0xb6   :  { %2538 = vmatpush.bf16.msrb.mxu3 %v4598_v19  ;;  %v3983_v19 = vld [vmem:[#allocation2 + $0x44c] sm:$0xf0]  ;;  %v479_v35 = vperm.slane %v5649_v22, 0 }
  0xb7   :  { %2527 = vmatmul.bf16.vlgmr.msra.gmra.mxu1 %v5625_v37  ;;  %2578 = vmatpush.bf16.msrb.mxu0 %v3678_v44  ;;  %v3986_v29 = vor.u32 %v5149_v18, %v3983_v19  ;;  %v4658_v44 = vor.u32 %v5317_v31, %v4655_v32  ;;  %v3902_v18 = vor.u32 %v5128_v5, %v3899_v6  ;;  %v5240_v19 = vld [vmem:[#allocation2 + $0x70c] sm:$0xf]  ;;  %v3877_v31 = vld [vmem:[#allocation2 + $0x358] sm:$0xf]  ;;  %v5125_v32 = vld [vmem:[#allocation2 + $0x370] sm:$0xf0] }
  0xb8   :  { %2584 = vmatpush.bf16.msrb.mxu1 %v4098_v30  ;;  %v4431_v30 = vld [vmem:[#allocation2 + $0x7cc] sm:$0xf0]  ;;  %v5223_v5 = vld [vmem:[#allocation2 + $0x680] sm:$0xf0] }
  0xb9   :  { %2565 = vmatpush.bf16.msrb.mxu2 %v3454_v43 }
  0xba   :  { %2539 = vmatpush.bf16.msrb.mxu3 %v4570_v38  ;;  %2579 = vmatmul.bf16.vlgmr.msrb.gmra.mxu0 %v5611_v21  ;;  %v4434_v38 = vor.u32 %v5261_v27, %v4431_v30  ;;  %v4571_v27 = vld [vmem:[#allocation2 + $0x8e4] sm:$0xf0]  ;;  %v5069_v30 = vld [vmem:[#allocation2 + $0x1b0] sm:$0xf0] }
  0xbb   :  { %2623 = vmatpush.bf16.msra.mxu0 %v4770_v50  ;;  %v2320_v41 = vpop.f32.mrf.mxu2  ;;  %v2294_v50 = vpop.f32.mrf.mxu0 }
  0xbc   :  { %2585 = vmatpush.bf16.msrb.mxu1 %v4070_v51  ;;  %2566 = vmatmul.bf16.vlgmr.msrb.gmra.mxu2 %v5609_v20  ;;  %v2333_v43 = vpop.f32.mrf.mxu3  ;;  %v2307_v51 = vpop.f32.mrf.mxu1  ;;  %v2295_v57 = vadd.f32 %v2294_v50, %v479_v35  ;;  %v5181_v35 = vld [vmem:[#allocation2 + $0x530] sm:$0xf0]  ;;  %v5118_v50 = vld [vmem:[#allocation2 + $0x338] sm:$0xf0] }
  0xbd   :  { %2610 = vmatpush.bf16.msra.mxu2 %v4546_v46  ;;  %2540 = vmatmul.bf16.vlgmr.msrb.gmra.mxu3 %v5627_v42  ;;  %v5254_v46 = vld [vmem:[#allocation2 + $0x77c] sm:$0xf] }
  0xbe   :  { %2597 = vmatpush.bf16.msra.mxu3 %v4322_v45  ;;  %v3958_v45 = vor.u32 %v5142_v33, %v3955_v34  ;;  %v4406_v59 = vor.u32 %v5254_v46, %v4403_v47  ;;  %v2308_v62 = vadd.f32 %v2307_v51, %v2295_v57  ;;  %v4101_v33 = vld [vmem:[#allocation2 + $0x518] sm:$0xf]  ;;  %v4073_v51 = vld [vmem:[#allocation2 + $0x4e0] sm:$0xf] }
  0xbf   :  { %2624 = vmatpush.bf16.msra.mxu0 %v4742_v0  ;;  %v3930_v0 = vor.u32 %v5135_v53, %v3927_v54  ;;  %v4102_v46 = vor.u32 %v5181_v35, %v4101_v33  ;;  %v4297_v53 = vld [vmem:[#allocation2 + $0x6a0] sm:$0xf]  ;;  %v5230_v54 = vld [vmem:[#allocation2 + $0x6b8] sm:$0xf0]  ;;  %v5097_v35 = vld [vmem:[#allocation2 + $0x290] sm:$0xf0] }
  0xc0   :  { %2586 = vmatpush.bf16.msrb.mxu1 %v4042_v1  ;;  %v5247_v1 = vld [vmem:[#allocation2 + $0x744] sm:$0xf]  ;;  %v2321_v7 = vadd.f32 %v2320_v41, %v2308_v62  ;;  %v4074_v62 = vor.u32 %v5174_v52, %v4073_v51  ;;  %v3737_v52 = vld [vmem:[#allocation2 + $0x240] sm:$0xf] }
  0xc1   :  { %2611 = vmatpush.bf16.msra.mxu2 %v4518_v61  ;;  %v4151_v61 = vld [vmem:[#allocation2 + $0x59c] sm:$0xf0]  ;;  %v4378_v11 = vor.u32 %v5247_v1, %v4375_v2  ;;  %v5111_v1 = vld [vmem:[#allocation2 + $0x300] sm:$0xf0]  ;;  %v4045_v2 = vld [vmem:[#allocation2 + $0x4a8] sm:$0xf] }
  0xc2   :  { %2598 = vmatpush.bf16.msra.mxu3 %v4294_v60  ;;  %v5191_v60 = vld [vmem:[#allocation2 + $0x584] sm:$0xf]  ;;  %v5652_v14 = vadd.f32 %v2333_v43, %v2321_v7  ;;  %v3878_v43 = vor.u32 %v5125_v32, %v3877_v31  ;;  %v480_v31 = vperm.slane %v5649_v22, 1 }
  0xc3   :  { %2625 = vmatpush.bf16.msra.mxu0 %v4714_v12  ;;  %v4154_v10 = vor.u32 %v5191_v60, %v4151_v61  ;;  %v5184_v12 = vld [vmem:[#allocation2 + $0x54c] sm:$0xf]  ;;  %v2322_v15 = vpop.f32.mrf.mxu2  ;;  %v2296_v25 = vpop.f32.mrf.mxu0  ;;  %v3597_v60 = vld [vmem:[#allocation2 + $0x128] sm:$0xf]  ;;  %v5055_v61 = vld [vmem:[#allocation2 + $0x140] sm:$0xf0] }
  0xc4   :  { %2587 = vmatpush.bf16.msrb.mxu1 %v4014_v13  ;;  %v4123_v13 = vld [vmem:[#allocation2 + $0x564] sm:$0xf0]  ;;  %v2335_v16 = vpop.f32.mrf.mxu3  ;;  %v2309_v26 = vpop.f32.mrf.mxu1  ;;  %v3598_v6 = vor.u32 %v5055_v61, %v3597_v60  ;;  %v5104_v15 = vld [vmem:[#allocation2 + $0x2c8] sm:$0xf0] }
  0xc5   :  { %2612 = vmatpush.bf16.msra.mxu2 %v4490_v9  ;;  %v4795_v9 = vld [vmem:[#allocation2 + $0xaa4] sm:$0xf0]  ;;  %v4126_v34 = vor.u32 %v5184_v12, %v4123_v13  ;;  %v4270_v12 = vor.u32 %v5223_v5, %v4269_v4  ;;  %v3793_v13 = vld [vmem:[#allocation2 + $0x2b0] sm:$0xf] }
  0xc6   :  { %2599 = vmatpush.bf16.msra.mxu3 %v4266_v8  ;;  %v5352_v8 = vld [vmem:[#allocation2 + $0xa8c] sm:$0xf]  ;;  %v4017_v16 = vld [vmem:[#allocation2 + $0x470] sm:$0xf]  ;;  %v3709_v5 = vld [vmem:[#allocation2 + $0x208] sm:$0xf] }
  0xc7   :  { %2626 = vmatpush.bf16.msra.mxu0 %v4686_v28  ;;  %v4798_v28 = vor.u32 %v5352_v8, %v4795_v9  ;;  %v3569_v8 = vld [vmem:[#allocation2 + $0xf0] sm:$0xf]  ;;  %v5048_v9 = vld [vmem:[#allocation2 + $0x108] sm:$0xf0] }
  0xc8   :  { %2588 = vmatpush.bf16.msrb.mxu1 %v3986_v29  ;;  %v3653_v29 = vld [vmem:[#allocation2 + $0x198] sm:$0xf] }
  0xc9   :  { %2613 = vmatpush.bf16.msra.mxu2 %v4462_v24  ;;  %v5296_v24 = vld [vmem:[#allocation2 + $0x8cc] sm:$0xf]  ;;  %v3654_v41 = vor.u32 %v5069_v30, %v3653_v29  ;;  %v3541_v29 = vld [vmem:[#allocation2 + $0xb8] sm:$0xf]  ;;  %v5041_v30 = vld [vmem:[#allocation2 + $0xd0] sm:$0xf0] }
  0xca   :  { %2600 = vmatpush.bf16.msra.mxu3 %v4238_v23  ;;  %v4347_v23 = vld [vmem:[#allocation2 + $0x724] sm:$0xf0]  ;;  %v4574_v40 = vor.u32 %v5296_v24, %v4571_v27  ;;  %v3570_v27 = vor.u32 %v5048_v9, %v3569_v8  ;;  %v5139_v8 = vld [vmem:[#allocation2 + $0x3e0] sm:$0xf0] }
  0xcb   :  { %2627 = vmatpush.bf16.msra.mxu0 %v4658_v44  ;;  %v4350_v39 = vor.u32 %v5240_v19, %v4347_v23  ;;  %v3625_v44 = vld [vmem:[#allocation2 + $0x160] sm:$0xf]  ;;  %v2372_v57 = vpop.f32.mrf.mxu2  ;;  %v4241_v19 = vld [vmem:[#allocation2 + $0x630] sm:$0xf]  ;;  %v5216_v23 = vld [vmem:[#allocation2 + $0x648] sm:$0xf0] }
  0xcc   :  { %2589 = vmatpush.bf16.msrb.mxu1 %v3958_v45  ;;  %v5062_v45 = vld [vmem:[#allocation2 + $0x178] sm:$0xf0]  ;;  %v4242_v33 = vor.u32 %v5216_v23, %v4241_v19  ;;  %v4157_v9 = vld [vmem:[#allocation2 + $0x588] sm:$0xf] }
  0xcd   :  { %2614 = vmatpush.bf16.msra.mxu2 %v4434_v38  ;;  %v5237_v38 = vld [vmem:[#allocation2 + $0x6f0] sm:$0xf0] }
  0xce   :  { %2601 = vmatpush.bf16.msra.mxu3 %v4210_v36  ;;  %v4325_v36 = vld [vmem:[#allocation2 + $0x6d8] sm:$0xf] }
  0xcf   :  { %2628 = vmatpush.bf16.msra.mxu0 %v4630_v63  ;;  %v4326_v47 = vor.u32 %v5237_v38, %v4325_v36  ;;  %v4298_v63 = vor.u32 %v5230_v54, %v4297_v53  ;;  %v3989_v36 = vld [vmem:[#allocation2 + $0x438] sm:$0xf]  ;;  %v5153_v38 = vld [vmem:[#allocation2 + $0x450] sm:$0xf0]  ;;  %v5090_v53 = vld [vmem:[#allocation2 + $0x258] sm:$0xf0] }
  0xd0   :  { %2590 = vmatpush.bf16.msrb.mxu1 %v3930_v0  ;;  %v3821_v0 = vld [vmem:[#allocation2 + $0x2e8] sm:$0xf]  ;;  %v3961_v54 = vld [vmem:[#allocation2 + $0x400] sm:$0xf] }
  0xd1   :  { %2615 = vmatpush.bf16.msra.mxu2 %v4406_v59  ;;  %v3850_v59 = vor.u32 %v5118_v50, %v3849_v49  ;;  %v3822_v7 = vor.u32 %v5111_v1, %v3821_v0  ;;  %v3990_v50 = vor.u32 %v5153_v38, %v3989_v36  ;;  %v3738_v0 = vor.u32 %v5090_v53, %v3737_v52  ;;  %v3485_v1 = vld [vmem:[#allocation2 + $0x48] sm:$0xf]  ;;  %v3655_v36 = vld [vmem:[#allocation2 + $0x1b4] sm:$0xf0]  ;;  %v4801_v38 = vld [vmem:[#allocation2 + $0xa90] sm:$0xf] }
  0xd2   :  { %2602 = vmatpush.bf16.msra.mxu3 %v4182_v58  ;;  %v3626_v58 = vor.u32 %v5062_v45, %v3625_v44  ;;  %v4745_v52 = vld [vmem:[#allocation2 + $0xa20] sm:$0xf]  ;;  %v5342_v53 = vld [vmem:[#allocation2 + $0xa38] sm:$0xf0] }
  0xd3   :  { %2629 = vmatpush.bf16.msra.mxu0 %v4602_v17  ;;  %v2374_v25 = vpop.f32.mrf.mxu2 }
  0xd4   :  { %2591 = vmatpush.bf16.msrb.mxu1 %v3902_v18  ;;  %v5160_v18 = vld [vmem:[#allocation2 + $0x488] sm:$0xf0]  ;;  %v2359_v24 = vpop.f32.mrf.mxu1 }
  0xd5   :  { %2616 = vmatpush.bf16.msra.mxu2 %v4378_v11  ;;  %v4046_v11 = vor.u32 %v5167_v3, %v4045_v2  ;;  %v4018_v32 = vor.u32 %v5160_v18, %v4017_v16  ;;  %v5027_v2 = vld [vmem:[#allocation2 + $0x60] sm:$0xf0]  ;;  %v5020_v16 = vld [vmem:[#allocation2 + $0x28] sm:$0xf0] }
  0xd6   :  { %2603 = vmatpush.bf16.msra.mxu3 %v4154_v10  ;;  %v2346_v10 = vpop.f32.mrf.mxu0  ;;  %v5076_v18 = vld [vmem:[#allocation2 + $0x1e8] sm:$0xf0] }
  0xd7   :  { %2592 = vmatmul.bf16.vlgmr.msrb.gmra.mxu1 %v5600_v55  ;;  %2630 = vmatpush.bf16.msra.mxu0 %v4574_v40  ;;  %v2347_v17 = vadd.f32 %v2346_v10, %v5652_v14  ;;  %v3765_v14 = vld [vmem:[#allocation2 + $0x278] sm:$0xf]  ;;  %v5209_v40 = vld [vmem:[#allocation2 + $0x610] sm:$0xf0]  ;;  %v5195_v10 = vld [vmem:[#allocation2 + $0x5a0] sm:$0xf0] }
  0xd8   :  { %2643 = vmatpush.bf16.msra.mxu1 %v4798_v28  ;;  %v3794_v28 = vor.u32 %v5104_v15, %v3793_v13  ;;  %v3766_v44 = vor.u32 %v5097_v35, %v3765_v14  ;;  %v3486_v13 = vor.u32 %v5027_v2, %v3485_v1  ;;  %v4158_v23 = vor.u32 %v5195_v10, %v4157_v9  ;;  %v5132_v25 = vld [vmem:[#allocation2 + $0x3a8] sm:$0xf0]  ;;  %v5279_v2 = vld [vmem:[#allocation2 + $0x840] sm:$0xf0] }
  0xd9   :  { %2617 = vmatpush.bf16.msra.mxu2 %v4350_v39  ;;  %v2360_v26 = vadd.f32 %v2359_v24, %v2347_v17  ;;  %v4213_v39 = vld [vmem:[#allocation2 + $0x5f8] sm:$0xf]  ;;  %v3681_v17 = vld [vmem:[#allocation2 + $0x1d0] sm:$0xf] }
  0xda   :  { %2604 = vmatpush.bf16.msra.mxu3 %v4126_v34  ;;  %2631 = vmatmul.bf16.vlgmr.msra.gmra.mxu0 %v5627_v42  ;;  %v4214_v51 = vor.u32 %v5209_v40, %v4213_v39  ;;  %v3905_v24 = vld [vmem:[#allocation2 + $0x390] sm:$0xf]  ;;  %v3682_v35 = vor.u32 %v5076_v18, %v3681_v17  ;;  %v5356_v39 = vld [vmem:[#allocation2 + $0xaa8] sm:$0xf0] }
  0xdb   :  { %2688 = vmatpush.bf16.msrb.mxu0 %v4326_v47  ;;  %v5660_v34 = vadd.f32 %v2372_v57, %v2360_v26  ;;  %v5034_v47 = vld [vmem:[#allocation2 + $0x98] sm:$0xf0]  ;;  %v4129_v26 = vld [vmem:[#allocation2 + $0x550] sm:$0xf]  ;;  %v3906_v40 = vor.u32 %v5132_v25, %v3905_v24  ;;  %v5272_v17 = vld [vmem:[#allocation2 + $0x808] sm:$0xf0] }
  0xdc   :  { %2662 = vmatpush.bf16.msrb.mxu1 %v3878_v43  ;;  %2618 = vmatmul.bf16.vlgmr.msra.gmra.mxu2 %v5625_v37  ;;  %v3542_v43 = vor.u32 %v5041_v30, %v3541_v29  ;;  %v5146_v57 = vld [vmem:[#allocation2 + $0x418] sm:$0xf0]  ;;  %v2361_v61 = vpop.f32.mrf.mxu1  ;;  %v5293_v29 = vld [vmem:[#allocation2 + $0x8b0] sm:$0xf0]  ;;  %v4689_v18 = vld [vmem:[#allocation2 + $0x9b0] sm:$0xf] }
  0xdd   :  { %2675 = vmatpush.bf16.msrb.mxu2 %v4102_v46  ;;  %2605 = vmatmul.bf16.vlgmr.msra.gmra.mxu3 %v5602_v56  ;;  %v3513_v46 = vld [vmem:[#allocation2 + $0x80] sm:$0xf]  ;;  %v3962_v3 = vor.u32 %v5146_v57, %v3961_v54  ;;  %v5059_v54 = vld [vmem:[#allocation2 + $0x164] sm:$0xf]  ;;  %v5045_v24 = vld [vmem:[#allocation2 + $0xf4] sm:$0xf] }
  0xde   :  { %2649 = vmatpush.bf16.msrb.mxu3 %v3654_v41  ;;  %v2385_v41 = vpop.f32.mrf.mxu3  ;;  %v2348_v49 = vpop.f32.mrf.mxu0  ;;  %v3627_v57 = vld [vmem:[#allocation2 + $0x17c] sm:$0xf0]  ;;  %v5115_v61 = vld [vmem:[#allocation2 + $0x324] sm:$0xf]  ;;  %v3571_v25 = vld [vmem:[#allocation2 + $0x10c] sm:$0xf0] }
  0xdf   :  { %2689 = vmatpush.bf16.msrb.mxu0 %v4298_v63  ;;  %v2386_v45 = vadd.f32 %v2385_v41, %v480_v31  ;;  %v2398_v60 = vpop.f32.mrf.mxu2  ;;  %v3514_v63 = vor.u32 %v5034_v47, %v3513_v46  ;;  %v4773_v31 = vld [vmem:[#allocation2 + $0xa58] sm:$0xf]  ;;  %v4521_v47 = vld [vmem:[#allocation2 + $0x860] sm:$0xf]  ;;  %v3630_v1 = vor.u32 %v5059_v54, %v3627_v57  ;;  %v5031_v57 = vld [vmem:[#allocation2 + $0x84] sm:$0xf] }
  0xe0   :  { %2663 = vmatpush.bf16.msrb.mxu1 %v3850_v59  ;;  %v5202_v59 = vld [vmem:[#allocation2 + $0x5d8] sm:$0xf0]  ;;  %v3879_v46 = vld [vmem:[#allocation2 + $0x374] sm:$0xf0] }
  0xe1   :  { %2676 = vmatpush.bf16.msrb.mxu2 %v4074_v62  ;;  %v5664_v62 = vadd.f32 %v2398_v60, %v2386_v45  ;;  %v5122_v45 = vld [vmem:[#allocation2 + $0x35c] sm:$0xf]  ;;  %v4746_v60 = vor.u32 %v5342_v53, %v4745_v52  ;;  %v4633_v52 = vld [vmem:[#allocation2 + $0x940] sm:$0xf] }
  0xe2   :  { %2650 = vmatpush.bf16.msrb.mxu3 %v3626_v58  ;;  %v4185_v58 = vld [vmem:[#allocation2 + $0x5c0] sm:$0xf]  ;;  %v5314_v53 = vld [vmem:[#allocation2 + $0x958] sm:$0xf0] }
  0xe3   :  { %2690 = vmatpush.bf16.msrb.mxu0 %v4270_v12  ;;  %v4186_v4 = vor.u32 %v5202_v59, %v4185_v58  ;;  %v3457_v12 = vld [vmem:[#allocation2 + $0x10] sm:$0xf]  ;;  %v3882_v58 = vor.u32 %v5122_v45, %v3879_v46  ;;  %v5094_v45 = vld [vmem:[#allocation2 + $0x27c] sm:$0xf]  ;;  %v3767_v46 = vld [vmem:[#allocation2 + $0x294] sm:$0xf0] }
  0xe4   :  { %2664 = vmatpush.bf16.msrb.mxu1 %v3822_v7  ;;  %v3933_v7 = vld [vmem:[#allocation2 + $0x3c8] sm:$0xf]  ;;  %v3458_v14 = vor.u32 %v5020_v16, %v3457_v12 }
  0xe5   :  { %2677 = vmatpush.bf16.msrb.mxu2 %v4046_v11  ;;  %v3934_v19 = vor.u32 %v5139_v8, %v3933_v7  ;;  %v3823_v12 = vld [vmem:[#allocation2 + $0x304] sm:$0xf0] }
  0xe6   :  { %2651 = vmatpush.bf16.msrb.mxu3 %v3598_v6  ;;  %v5083_v6 = vld [vmem:[#allocation2 + $0x220] sm:$0xf0]  ;;  %v2387_v11 = vpop.f32.mrf.mxu3 }
  0xe7   :  { %2691 = vmatpush.bf16.msrb.mxu0 %v4242_v33  ;;  %4814 = vmatmul.msk.bf16.vlgmr.msra.gmra.mxu1 %vm2281_vm0, %v5618_v48  ;;  %v3710_v15 = vor.u32 %v5083_v6, %v3709_v5  ;;  %v2400_v30 = vpop.f32.mrf.mxu2  ;;  %v5066_v33 = vld [vmem:[#allocation2 + $0x19c] sm:$0xf]  ;;  %v5052_v5 = vld [vmem:[#allocation2 + $0x12c] sm:$0xf]  ;;  %v3599_v6 = vld [vmem:[#allocation2 + $0x144] sm:$0xf0] }
  0xe8   :  { %2665 = vmatpush.bf16.msrb.mxu1 %v3794_v28  ;;  %v4549_v28 = vld [vmem:[#allocation2 + $0x898] sm:$0xf]  ;;  %v3658_v49 = vor.u32 %v5066_v33, %v3655_v36  ;;  %v5108_v11 = vld [vmem:[#allocation2 + $0x2ec] sm:$0xf]  ;;  %v3602_v16 = vor.u32 %v5052_v5, %v3599_v6  ;;  %v5101_v30 = vld [vmem:[#allocation2 + $0x2b4] sm:$0xf] }
  0xe9   :  { %2678 = vmatpush.bf16.msrb.mxu2 %v4018_v32  ;;  %v5349_v32 = vld [vmem:[#allocation2 + $0xa70] sm:$0xf0]  ;;  %v5038_v36 = vld [vmem:[#allocation2 + $0xbc] sm:$0xf]  ;;  %v5251_v5 = vld [vmem:[#allocation2 + $0x760] sm:$0xf0] }
  0xea   :  { %2652 = vmatpush.bf16.msrb.mxu3 %v3570_v27  ;;  %v5188_v27 = vld [vmem:[#allocation2 + $0x568] sm:$0xf0]  ;;  %v5265_v33 = vld [vmem:[#allocation2 + $0x7d0] sm:$0xf0]  ;;  %v4605_v6 = vld [vmem:[#allocation2 + $0x908] sm:$0xf] }
  0xeb   :  { %2692 = vmatpush.bf16.msrb.mxu0 %v4214_v51  ;;  %v4130_v41 = vor.u32 %v5188_v27, %v4129_v26  ;;  %v5286_v51 = vld [vmem:[#allocation2 + $0x878] sm:$0xf0]  ;;  %v3826_v27 = vor.u32 %v5108_v11, %v3823_v12  ;;  %v5080_v12 = vld [vmem:[#allocation2 + $0x20c] sm:$0xf] }
  0xec   :  { %2666 = vmatpush.bf16.msrb.mxu1 %v3766_v44  ;;  %v4774_v44 = vor.u32 %v5349_v32, %v4773_v31  ;;  %v4522_v59 = vor.u32 %v5286_v51, %v4521_v47  ;;  %v3795_v31 = vld [vmem:[#allocation2 + $0x2cc] sm:$0xf0]  ;;  %v4437_v32 = vld [vmem:[#allocation2 + $0x7b8] sm:$0xf]  ;;  %v4409_v47 = vld [vmem:[#allocation2 + $0x780] sm:$0xf] }
  0xed   :  { %2679 = vmatpush.bf16.msrb.mxu2 %v3990_v50  ;;  %v4802_v50 = vor.u32 %v5356_v39, %v4801_v38  ;;  %v3543_v38 = vld [vmem:[#allocation2 + $0xd4] sm:$0xf0]  ;;  %v5258_v51 = vld [vmem:[#allocation2 + $0x798] sm:$0xf0] }
  0xee   :  { %2653 = vmatpush.bf16.msrb.mxu3 %v3542_v43  ;;  %v4550_v43 = vor.u32 %v5293_v29, %v4549_v28 }
  0xef   :  { %2693 = vmatpush.bf16.msrb.mxu0 %v4186_v4  ;;  %v5335_v4 = vld [vmem:[#allocation2 + $0xa00] sm:$0xf0] }
  0xf0   :  { %2667 = vmatpush.bf16.msrb.mxu1 %v3738_v0  ;;  %v4493_v0 = vld [vmem:[#allocation2 + $0x828] sm:$0xf] }
  0xf1   :  { %2680 = vmatpush.bf16.msrb.mxu2 %v3962_v3  ;;  %v4717_v3 = vld [vmem:[#allocation2 + $0x9e8] sm:$0xf]  ;;  %v4494_v9 = vor.u32 %v5279_v2, %v4493_v0  ;;  %v4634_v0 = vor.u32 %v5314_v53, %v4633_v52  ;;  %v3739_v2 = vld [vmem:[#allocation2 + $0x25c] sm:$0xf0]  ;;  %v5283_v53 = vld [vmem:[#allocation2 + $0x864] sm:$0xf] }
  0xf2   :  { %2654 = vmatpush.bf16.msrb.mxu3 %v3514_v63  ;;  %v3851_v63 = vld [vmem:[#allocation2 + $0x33c] sm:$0xf0]  ;;  %v4718_v10 = vor.u32 %v5335_v4, %v4717_v3  ;;  %v4381_v3 = vld [vmem:[#allocation2 + $0x748] sm:$0xf] }
  0xf3   :  { %2694 = vmatpush.bf16.msrb.mxu0 %v4158_v23  ;;  %v3854_v7 = vor.u32 %v5115_v61, %v3851_v63  ;;  %v2411_v8 = vpop.f32.mrf.mxu0  ;;  %v3770_v61 = vor.u32 %v5094_v45, %v3767_v46  ;;  %v4410_v63 = vor.u32 %v5258_v51, %v4409_v47  ;;  %v5171_v46 = vld [vmem:[#allocation2 + $0x4e4] sm:$0xf]  ;;  %v4075_v47 = vld [vmem:[#allocation2 + $0x4fc] sm:$0xf0] }
  0xf4   :  { %2668 = vmatpush.bf16.msrb.mxu1 %v3710_v15  ;;  %v2412_v15 = vadd.f32 %v2411_v8, %v5664_v62  ;;  %v2424_v23 = vpop.f32.mrf.mxu1  ;;  %v3574_v62 = vor.u32 %v5045_v24, %v3571_v25  ;;  %v5024_v8 = vld [vmem:[#allocation2 + $0x4c] sm:$0xf]  ;;  %v5017_v25 = vld [vmem:[#allocation2 + $0x14] sm:$0xf]  ;;  %v4299_v52 = vld [vmem:[#allocation2 + $0x6bc] sm:$0xf0] }
  0xf5   :  { %2681 = vmatpush.bf16.msrb.mxu2 %v3934_v19  ;;  %v5328_v19 = vld [vmem:[#allocation2 + $0x9c8] sm:$0xf0] }
  0xf6   :  { %2655 = vmatpush.bf16.msrb.mxu3 %v3486_v13  ;;  %v4465_v13 = vld [vmem:[#allocation2 + $0x7f0] sm:$0xf]  ;;  %v2425_v26 = vadd.f32 %v2424_v23, %v2412_v15  ;;  %v4690_v29 = vor.u32 %v5328_v19, %v4689_v18  ;;  %v4382_v15 = vor.u32 %v5251_v5, %v4381_v3  ;;  %v5244_v18 = vld [vmem:[#allocation2 + $0x728] sm:$0xf0]  ;;  %v4047_v3 = vld [vmem:[#allocation2 + $0x4c4] sm:$0xf0] }
  0xf7   :  { %2695 = vmatpush.bf16.msrb.mxu0 %v4130_v41  ;;  %v4466_v28 = vor.u32 %v5272_v17, %v4465_v13  ;;  %v3711_v13 = vld [vmem:[#allocation2 + $0x224] sm:$0xf0]  ;;  %v4353_v17 = vld [vmem:[#allocation2 + $0x710] sm:$0xf]  ;;  %v5300_v24 = vld [vmem:[#allocation2 + $0x8e8] sm:$0xf0] }
  0xf8   :  { %2669 = vmatpush.bf16.msrb.mxu1 %v3682_v35  ;;  %v5321_v35 = vld [vmem:[#allocation2 + $0x990] sm:$0xf0]  ;;  %v4577_v19 = vld [vmem:[#allocation2 + $0x8d0] sm:$0xf]  ;;  %v4271_v5 = vld [vmem:[#allocation2 + $0x684] sm:$0xf0] }
  0xf9   :  { %2682 = vmatpush.bf16.msrb.mxu2 %v3906_v40  ;;  %v3798_v40 = vor.u32 %v5101_v30, %v3795_v31  ;;  %v3714_v31 = vor.u32 %v5080_v12, %v3711_v13  ;;  %v5157_v13 = vld [vmem:[#allocation2 + $0x474] sm:$0xf] }
  0xfa   :  { %2656 = vmatpush.bf16.msrb.mxu3 %v3458_v14  ;;  %2696 = vmatmul.bf16.vlgmr.msrb.gmra.mxu0 %v5602_v56  ;;  %v4661_v14 = vld [vmem:[#allocation2 + $0x978] sm:$0xf] }
  0xfb   :  { %2740 = vmatpush.bf16.msra.mxu0 %v3658_v49  ;;  %2670 = vmatmul.bf16.vlgmr.msrb.gmra.mxu1 %v5611_v21  ;;  %v2413_v49 = vpop.f32.mrf.mxu0 }
  0xfc   :  { %2714 = vmatpush.bf16.msra.mxu1 %v4774_v44  ;;  %2683 = vmatmul.bf16.vlgmr.msrb.gmra.mxu2 %v5600_v55  ;;  %v2437_v39 = vpop.f32.mrf.mxu3  ;;  %v4662_v44 = vor.u32 %v5321_v35, %v4661_v14  ;;  %v4354_v14 = vor.u32 %v5244_v18, %v4353_v17  ;;  %v4578_v35 = vor.u32 %v5300_v24, %v4577_v19  ;;  %v5227_v49 = vld [vmem:[#allocation2 + $0x6a4] sm:$0xf]  ;;  %v4243_v18 = vld [vmem:[#allocation2 + $0x64c] sm:$0xf0]  ;;  %v5269_v19 = vld [vmem:[#allocation2 + $0x7f4] sm:$0xf] }
  0xfd   :  { %2734 = vmatpush.bf16.msra.mxu2 %v4802_v50  ;;  %2657 = vmatmul.bf16.vlgmr.msrb.gmra.mxu3 %v5609_v20  ;;  %v2438_v41 = vadd.f32 %v2437_v39, %v2425_v26  ;;  %v3546_v50 = vor.u32 %v5038_v36, %v3543_v38  ;;  %v3459_v26 = vld [vmem:[#allocation2 + $0x2c] sm:$0xf0]  ;;  %v5073_v36 = vld [vmem:[#allocation2 + $0x1d4] sm:$0xf] }
  0xfe   :  { %2701 = vmatpush.bf16.msra.mxu3 %v4550_v43  ;;  %v4438_v43 = vor.u32 %v5265_v33, %v4437_v32  ;;  %v4327_v32 = vld [vmem:[#allocation2 + $0x6f4] sm:$0xf0]  ;;  %v3683_v38 = vld [vmem:[#allocation2 + $0x1ec] sm:$0xf0]  ;;  %v3462_v39 = vor.u32 %v5017_v25, %v3459_v26  ;;  %v481_v26 = vperm.slane %v5649_v22, 2 }
  0xff   :  { %2741 = vmatpush.bf16.msra.mxu0 %v3630_v1  ;;  %v2450_v54 = vpop.f32.mrf.mxu2  ;;  %v5087_v1 = vld [vmem:[#allocation2 + $0x244] sm:$0xf]  ;;  %v4551_v33 = vld [vmem:[#allocation2 + $0x8b4] sm:$0xf0]  ;;  %v3686_v51 = vor.u32 %v5073_v36, %v3683_v38  ;;  %v5262_v36 = vld [vmem:[#allocation2 + $0x7bc] sm:$0xf] }
 0x100   :  { %2715 = vmatpush.bf16.msra.mxu1 %v4746_v60  ;;  %v5671_v60 = vadd.f32 %v2450_v54, %v2438_v41  ;;  %v3742_v11 = vor.u32 %v5087_v1, %v3739_v2  ;;  %v5346_v41 = vld [vmem:[#allocation2 + $0xa5c] sm:$0xf]  ;;  %v4523_v54 = vld [vmem:[#allocation2 + $0x87c] sm:$0xf0]  ;;  %v5164_v2 = vld [vmem:[#allocation2 + $0x4ac] sm:$0xf] }
 0x101   :  { %2753 = vmatpush.bf16.msrb.mxu2 %v3882_v58  ;;  %v3515_v58 = vld [vmem:[#allocation2 + $0x9c] sm:$0xf0]  ;;  %v4526_v1 = vor.u32 %v5283_v53, %v4523_v54  ;;  %v4439_v38 = vld [vmem:[#allocation2 + $0x7d4] sm:$0xf0] }
 0x102   :  { %2702 = vmatpush.bf16.msra.mxu3 %v4522_v59  ;;  %v2426_v59 = vpop.f32.mrf.mxu1  ;;  %v3518_v4 = vor.u32 %v5031_v57, %v3515_v58  ;;  %v4411_v53 = vld [vmem:[#allocation2 + $0x79c] sm:$0xf0] }
 0x103   :  { %2742 = vmatpush.bf16.msra.mxu0 %v3602_v16  ;;  %v4078_v59 = vor.u32 %v5171_v46, %v4075_v47  ;;  %v5143_v46 = vld [vmem:[#allocation2 + $0x404] sm:$0xf]  ;;  %v3963_v47 = vld [vmem:[#allocation2 + $0x41c] sm:$0xf0] }
 0x104   :  { %2716 = vmatpush.bf16.msra.mxu1 %v4718_v10  ;;  %v2439_v10 = vpop.f32.mrf.mxu3 }
 0x105   :  { %2754 = vmatpush.bf16.msrb.mxu2 %v3854_v7  ;;  %v5307_v7 = vld [vmem:[#allocation2 + $0x920] sm:$0xf0]  ;;  %v4719_v10 = vld [vmem:[#allocation2 + $0xa04] sm:$0xf0] }
 0x106   :  { %2703 = vmatpush.bf16.msra.mxu3 %v4494_v9  ;;  %v3487_v9 = vld [vmem:[#allocation2 + $0x64] sm:$0xf0]  ;;  %v4606_v16 = vor.u32 %v5307_v7, %v4605_v6  ;;  %v5276_v6 = vld [vmem:[#allocation2 + $0x82c] sm:$0xf] }
 0x107   :  { %2743 = vmatpush.bf16.msra.mxu0 %v3574_v62  ;;  %v3490_v23 = vor.u32 %v5024_v8, %v3487_v9  ;;  %v2452_v30 = vpop.f32.mrf.mxu2  ;;  %v5290_v62 = vld [vmem:[#allocation2 + $0x89c] sm:$0xf]  ;;  %v4050_v8 = vor.u32 %v5164_v2, %v4047_v3  ;;  %v5332_v9 = vld [vmem:[#allocation2 + $0x9ec] sm:$0xf] }
 0x108   :  { %2717 = vmatpush.bf16.msra.mxu1 %v4690_v29  ;;  %v5234_v29 = vld [vmem:[#allocation2 + $0x6dc] sm:$0xf]  ;;  %v4554_v45 = vor.u32 %v5290_v62, %v4551_v33  ;;  %v4722_v25 = vor.u32 %v5332_v9, %v4719_v10  ;;  %v3991_v33 = vld [vmem:[#allocation2 + $0x454] sm:$0xf0]  ;;  %v5248_v9 = vld [vmem:[#allocation2 + $0x74c] sm:$0xf] }
 0x109   :  { %2755 = vmatpush.bf16.msrb.mxu2 %v3826_v27  ;;  %v5178_v27 = vld [vmem:[#allocation2 + $0x51c] sm:$0xf]  ;;  %v4383_v10 = vld [vmem:[#allocation2 + $0x764] sm:$0xf0] }
 0x10a   :  { %2704 = vmatpush.bf16.msra.mxu3 %v4466_v28  ;;  %v4103_v28 = vld [vmem:[#allocation2 + $0x534] sm:$0xf0]  ;;  %v5150_v62 = vld [vmem:[#allocation2 + $0x43c] sm:$0xf] }
 0x10b   :  { %2744 = vmatpush.bf16.msra.mxu0 %v3546_v50  ;;  %v3994_v22 = vor.u32 %v5150_v62, %v3991_v33  ;;  %v4109_v62 = vld [vmem:[#allocation2 + $0x520] sm:$0xf]  ;;  %v5182_v33 = vld [vmem:[#allocation2 + $0x538] sm:$0xf0] }
 0x10c   :  { %2718 = vmatpush.bf16.msra.mxu1 %v4662_v44  ;;  %4815 = vmatmul.msk.bf16.vlgmr.msra.gmra.mxu2 %vm2281_vm0, %v5618_v48  ;;  %v4330_v44 = vor.u32 %v5234_v29, %v4327_v32  ;;  %v2463_v50 = vpop.f32.mrf.mxu3  ;;  %v4691_v29 = vld [vmem:[#allocation2 + $0x9cc] sm:$0xf0] }
 0x10d   :  { %2756 = vmatpush.bf16.msrb.mxu2 %v3798_v40  ;;  %v4106_v40 = vor.u32 %v5178_v27, %v4103_v28  ;;  %v5676_v57 = vadd.f32 %v2463_v50, %v5671_v60  ;;  %v4495_v60 = vld [vmem:[#allocation2 + $0x844] sm:$0xf0]  ;;  %v5325_v28 = vld [vmem:[#allocation2 + $0x9b4] sm:$0xf] }
 0x10e   :  { %2705 = vmatpush.bf16.msra.mxu3 %v4438_v43  ;;  %v4775_v43 = vld [vmem:[#allocation2 + $0xa74] sm:$0xf0]  ;;  %v4498_v12 = vor.u32 %v5276_v6, %v4495_v60  ;;  %v3935_v6 = vld [vmem:[#allocation2 + $0x3e4] sm:$0xf0]  ;;  %v5192_v60 = vld [vmem:[#allocation2 + $0x58c] sm:$0xf] }
 0x10f   :  { %2745 = vmatpush.bf16.msra.mxu0 %v3518_v4  ;;  %v4778_v58 = vor.u32 %v5346_v41, %v4775_v43  ;;  %v5220_v4 = vld [vmem:[#allocation2 + $0x66c] sm:$0xf]  ;;  %v5318_v41 = vld [vmem:[#allocation2 + $0x97c] sm:$0xf]  ;;  %v4663_v43 = vld [vmem:[#allocation2 + $0x994] sm:$0xf0] }
 0x110   :  { %2719 = vmatpush.bf16.msra.mxu1 %v4634_v0  ;;  %v4302_v0 = vor.u32 %v5227_v49, %v4299_v52  ;;  %v5199_v49 = vld [vmem:[#allocation2 + $0x5c4] sm:$0xf] }
 0x111   :  { %2757 = vmatpush.bf16.msrb.mxu2 %v3770_v61  ;;  %v5339_v61 = vld [vmem:[#allocation2 + $0xa24] sm:$0xf] }
 0x112   :  { %2706 = vmatpush.bf16.msra.mxu3 %v4410_v63  ;;  %v4747_v63 = vld [vmem:[#allocation2 + $0xa3c] sm:$0xf0]  ;;  %v5255_v52 = vld [vmem:[#allocation2 + $0x784] sm:$0xf] }
 0x113   :  { %2746 = vmatpush.bf16.msra.mxu0 %v3490_v23  ;;  %v4750_v7 = vor.u32 %v5339_v61, %v4747_v63  ;;  %v2502_v17 = vpop.f32.mrf.mxu0  ;;  %v4467_v23 = vld [vmem:[#allocation2 + $0x80c] sm:$0xf0]  ;;  %v3966_v63 = vor.u32 %v5143_v46, %v3963_v47  ;;  %v4110_v46 = vor.u32 %v5182_v33, %v4109_v62  ;;  %v3885_v47 = vld [vmem:[#allocation2 + $0x360] sm:$0xf] }
 0x114   :  { %2720 = vmatpush.bf16.msra.mxu1 %v4606_v16  ;;  %v5213_v16 = vld [vmem:[#allocation2 + $0x634] sm:$0xf]  ;;  %v2465_v24 = vpop.f32.mrf.mxu3  ;;  %v2476_v30 = vpop.f32.mrf.mxu1  ;;  %v4470_v32 = vor.u32 %v5269_v19, %v4467_v23  ;;  %v4386_v23 = vor.u32 %v5248_v9, %v4383_v10 }
 0x115   :  { %2758 = vmatpush.bf16.msrb.mxu2 %v3742_v11  ;;  %v4274_v11 = vor.u32 %v5220_v4, %v4271_v5  ;;  %v4414_v4 = vor.u32 %v5255_v52, %v4411_v53  ;;  %v5136_v5 = vld [vmem:[#allocation2 + $0x3cc] sm:$0xf]  ;;  %v3907_v24 = vld [vmem:[#allocation2 + $0x3ac] sm:$0xf0]  ;;  %v5063_v52 = vld [vmem:[#allocation2 + $0x180] sm:$0xf0] }
 0x116   :  { %2707 = vmatpush.bf16.msra.mxu3 %v4382_v15  ;;  %v4019_v15 = vld [vmem:[#allocation2 + $0x48c] sm:$0xf0]  ;;  %v4081_v53 = vld [vmem:[#allocation2 + $0x4e8] sm:$0xf] }
 0x117   :  { %2747 = vmatpush.bf16.msra.mxu0 %v3462_v39  ;;  %v4022_v27 = vor.u32 %v5157_v13, %v4019_v15  ;;  %v4694_v39 = vor.u32 %v5325_v28, %v4691_v29  ;;  %v3938_v13 = vor.u32 %v5136_v5, %v3935_v6  ;;  %v5304_v15 = vld [vmem:[#allocation2 + $0x90c] sm:$0xf]  ;;  %v4355_v28 = vld [vmem:[#allocation2 + $0x72c] sm:$0xf0]  ;;  %v3661_v29 = vld [vmem:[#allocation2 + $0x1a0] sm:$0xf] }
 0x118   :  { %2721 = vmatpush.bf16.msra.mxu1 %v4578_v35  ;;  %v4215_v35 = vld [vmem:[#allocation2 + $0x614] sm:$0xf0]  ;;  %v5119_v5 = vld [vmem:[#allocation2 + $0x340] sm:$0xf0]  ;;  %v3605_v6 = vld [vmem:[#allocation2 + $0x130] sm:$0xf] }
 0x119   :  { %2759 = vmatpush.bf16.msrb.mxu2 %v3714_v31  ;;  %v4246_v31 = vor.u32 %v5213_v16, %v4243_v18  ;;  %v4607_v16 = vld [vmem:[#allocation2 + $0x924] sm:$0xf0]  ;;  %v5129_v18 = vld [vmem:[#allocation2 + $0x394] sm:$0xf] }
 0x11a   :  { %2708 = vmatpush.bf16.msra.mxu3 %v4354_v14  ;;  %2748 = vmatmul.bf16.vlgmr.msra.gmra.mxu0 %v5609_v20  ;;  %v5206_v14 = vld [vmem:[#allocation2 + $0x5fc] sm:$0xf] }
 0x11b   :  { %2792 = vmatpush.bf16.msrb.mxu0 %v4554_v45  ;;  %2722 = vmatmul.bf16.vlgmr.msra.gmra.mxu1 %v5627_v42  ;;  %v4442_v45 = vor.u32 %v5262_v36, %v4439_v38  ;;  %v2504_v50 = vpop.f32.mrf.mxu0  ;;  %v5297_v36 = vld [vmem:[#allocation2 + $0x8d4] sm:$0xf]  ;;  %v4579_v38 = vld [vmem:[#allocation2 + $0x8ec] sm:$0xf0] }
 0x11c   :  { %2779 = vmatpush.bf16.msrb.mxu1 %v4330_v44  ;;  %v4218_v44 = vor.u32 %v5206_v14, %v4215_v35  ;;  %v2478_v2 = vpop.f32.mrf.mxu1  ;;  %v3910_v35 = vor.u32 %v5129_v18, %v3907_v24  ;;  %v3633_v50 = vld [vmem:[#allocation2 + $0x168] sm:$0xf]  ;;  %v3577_v24 = vld [vmem:[#allocation2 + $0xf8] sm:$0xf] }
 0x11d   :  { %2709 = vmatmul.bf16.vlgmr.msra.gmra.mxu3 %v5625_v37  ;;  %2760 = vmatpush.bf16.msrb.mxu2 %v3686_v51  ;;  %v4187_v51 = vld [vmem:[#allocation2 + $0x5dc] sm:$0xf0]  ;;  %v3634_v2 = vor.u32 %v5063_v52, %v3633_v50  ;;  %v3521_v50 = vld [vmem:[#allocation2 + $0x88] sm:$0xf]  ;;  %v5035_v52 = vld [vmem:[#allocation2 + $0xa0] sm:$0xf0] }
 0x11e   :  { %2766 = vmatpush.bf16.msrb.mxu3 %v4106_v40  ;;  %v2477_v40 = vadd.f32 %v2476_v30, %v481_v26  ;;  %v4190_v3 = vor.u32 %v5199_v49, %v4187_v51  ;;  %v4131_v26 = vld [vmem:[#allocation2 + $0x56c] sm:$0xf0]  ;;  %v5126_v49 = vld [vmem:[#allocation2 + $0x378] sm:$0xf0]  ;;  %v4582_v51 = vor.u32 %v5297_v36, %v4579_v38  ;;  %v3997_v38 = vld [vmem:[#allocation2 + $0x440] sm:$0xf] }
 0x11f   :  { %2793 = vmatpush.bf16.msrb.mxu0 %v4526_v1  ;;  %v2515_v61 = vpop.f32.mrf.mxu2  ;;  %v4635_v1 = vld [vmem:[#allocation2 + $0x95c] sm:$0xf0]  ;;  %v5042_v36 = vld [vmem:[#allocation2 + $0xd8] sm:$0xf0] }
 0x120   :  { %2780 = vmatpush.bf16.msrb.mxu1 %v4302_v0  ;;  %2761 = vmatmul.bf16.vlgmr.msrb.gmra.mxu2 %v5611_v21  ;;  %v2489_v54 = vpop.f32.mrf.mxu3  ;;  %v5311_v0 = vld [vmem:[#allocation2 + $0x944] sm:$0xf] }
 0x121   :  { %2805 = vmatpush.bf16.msra.mxu2 %v4778_v58  ;;  %v4666_v58 = vor.u32 %v5318_v41, %v4663_v43  ;;  %v4803_v41 = vld [vmem:[#allocation2 + $0xaac] sm:$0xf0]  ;;  %v4333_v43 = vld [vmem:[#allocation2 + $0x6e0] sm:$0xf] }
 0x122   :  { %2767 = vmatpush.bf16.msrb.mxu3 %v4078_v59  ;;  %v2490_v59 = vadd.f32 %v2489_v54, %v2477_v40  ;;  %v5175_v54 = vld [vmem:[#allocation2 + $0x500] sm:$0xf0] }
 0x123   :  { %2794 = vmatpush.bf16.msrb.mxu0 %v4498_v12 }
 0x124   :  { %2781 = vmatpush.bf16.msrb.mxu1 %v4274_v11  ;;  %v4638_v11 = vor.u32 %v5311_v0, %v4635_v1  ;;  %v5231_v0 = vld [vmem:[#allocation2 + $0x6c0] sm:$0xf0] }
 0x125   :  { %2806 = vmatpush.bf16.msra.mxu2 %v4750_v7  ;;  %v2503_v7 = vadd.f32 %v2502_v17, %v2490_v59  ;;  %v5685_v17 = vpop.f32.mrf.mxu0 }
 0x126   :  { %2768 = vmatpush.bf16.msrb.mxu3 %v4050_v8  ;;  %v4159_v8 = vld [vmem:[#allocation2 + $0x5a4] sm:$0xf0] }
 0x127   :  { %2795 = vmatpush.bf16.msrb.mxu0 %v4470_v32  ;;  %v5683_v12 = vadd.f32 %v2515_v61, %v2503_v7  ;;  %v4162_v19 = vor.u32 %v5192_v60, %v4159_v8  ;;  %v5070_v32 = vld [vmem:[#allocation2 + $0x1b8] sm:$0xf0]  ;;  %v2517_v14 = vpop.f32.mrf.mxu2  ;;  %v3886_v61 = vor.u32 %v5126_v49, %v3885_v47  ;;  %v5056_v60 = vld [vmem:[#allocation2 + $0x148] sm:$0xf0]  ;;  %v4053_v7 = vld [vmem:[#allocation2 + $0x4b0] sm:$0xf] }
 0x128   :  { %2782 = vmatpush.bf16.msrb.mxu1 %v4246_v31  ;;  %v2491_v30 = vpop.f32.mrf.mxu3  ;;  %v4610_v31 = vor.u32 %v5304_v15, %v4607_v16  ;;  %v5168_v8 = vld [vmem:[#allocation2 + $0x4c8] sm:$0xf0]  ;;  %v3606_v16 = vor.u32 %v5056_v60, %v3605_v6  ;;  %v3801_v14 = vld [vmem:[#allocation2 + $0x2b8] sm:$0xf]  ;;  %v3773_v47 = vld [vmem:[#allocation2 + $0x280] sm:$0xf] }
 0x129   :  { %2807 = vmatpush.bf16.msra.mxu2 %v4722_v25  ;;  %v5185_v25 = vld [vmem:[#allocation2 + $0x554] sm:$0xf]  ;;  %v4054_v18 = vor.u32 %v5168_v8, %v4053_v7  ;;  %v5098_v49 = vld [vmem:[#allocation2 + $0x298] sm:$0xf0]  ;;  %v5091_v6 = vld [vmem:[#allocation2 + $0x260] sm:$0xf0] }
 0x12a   :  { %2769 = vmatpush.bf16.msrb.mxu3 %v4022_v27  ;;  %v5241_v27 = vld [vmem:[#allocation2 + $0x714] sm:$0xf]  ;;  %v4134_v40 = vor.u32 %v5185_v25, %v4131_v26  ;;  %v3493_v60 = vld [vmem:[#allocation2 + $0x50] sm:$0xf]  ;;  %v5028_v8 = vld [vmem:[#allocation2 + $0x68] sm:$0xf0] }
 0x12b   :  { %2796 = vmatpush.bf16.msrb.mxu0 %v4442_v45  ;;  %v3662_v45 = vor.u32 %v5070_v32, %v3661_v29  ;;  %v5049_v26 = vld [vmem:[#allocation2 + $0x110] sm:$0xf0] }
 0x12c   :  { %2783 = vmatpush.bf16.msrb.mxu1 %v4218_v44  ;;  %v5238_v44 = vld [vmem:[#allocation2 + $0x6f8] sm:$0xf0]  ;;  %v5217_v32 = vld [vmem:[#allocation2 + $0x650] sm:$0xf0]  ;;  %v3578_v62 = vor.u32 %v5049_v26, %v3577_v24  ;;  %v3465_v26 = vld [vmem:[#allocation2 + $0x18] sm:$0xf] }
 0x12d   :  { %2808 = vmatpush.bf16.msra.mxu2 %v4694_v39  ;;  %v5353_v39 = vld [vmem:[#allocation2 + $0xa94] sm:$0xf]  ;;  %v4334_v59 = vor.u32 %v5238_v44, %v4333_v43  ;;  %v2556_v1 = vpop.f32.mrf.mxu0  ;;  %v4221_v43 = vld [vmem:[#allocation2 + $0x600] sm:$0xf]  ;;  %v5210_v44 = vld [vmem:[#allocation2 + $0x618] sm:$0xf0] }
 0x12e   :  { %2770 = vmatpush.bf16.msrb.mxu3 %v3994_v22  ;;  %v4358_v22 = vor.u32 %v5241_v27, %v4355_v28  ;;  %v4025_v27 = vld [vmem:[#allocation2 + $0x478] sm:$0xf]  ;;  %v5161_v28 = vld [vmem:[#allocation2 + $0x490] sm:$0xf0]  ;;  %v4193_v1 = vld [vmem:[#allocation2 + $0x5c8] sm:$0xf] }
 0x12f   :  { %2797 = vmatpush.bf16.msrb.mxu0 %v4414_v4  ;;  %v3857_v4 = vld [vmem:[#allocation2 + $0x328] sm:$0xf]  ;;  %v4026_v33 = vor.u32 %v5161_v28, %v4025_v27  ;;  %v5021_v27 = vld [vmem:[#allocation2 + $0x30] sm:$0xf0] }
 0x130   :  { %2784 = vmatpush.bf16.msrb.mxu1 %v4190_v3  ;;  %v4082_v3 = vor.u32 %v5175_v54, %v4081_v53  ;;  %v3858_v10 = vor.u32 %v5119_v5, %v3857_v4  ;;  %v3969_v53 = vld [vmem:[#allocation2 + $0x408] sm:$0xf]  ;;  %v5147_v54 = vld [vmem:[#allocation2 + $0x420] sm:$0xf0]  ;;  %v5133_v28 = vld [vmem:[#allocation2 + $0x3b0] sm:$0xf0] }
 0x131   :  { %2809 = vmatpush.bf16.msra.mxu2 %v4666_v58  ;;  %v4806_v58 = vor.u32 %v5353_v39, %v4803_v41  ;;  %v5154_v39 = vld [vmem:[#allocation2 + $0x458] sm:$0xf0]  ;;  %v3970_v4 = vor.u32 %v5147_v54, %v3969_v53  ;;  %v3745_v5 = vld [vmem:[#allocation2 + $0x248] sm:$0xf] }
 0x132   :  { %2771 = vmatpush.bf16.msrb.mxu3 %v3966_v63  ;;  %v4305_v63 = vld [vmem:[#allocation2 + $0x6a8] sm:$0xf]  ;;  %v5365_v53 = vld [vmem:[#allocation7 + $0x38] sm:$0xff] }
 0x133   :  { %2798 = vmatpush.bf16.msrb.mxu0 %v4386_v23  ;;  %v4306_v9 = vor.u32 %v5231_v0, %v4305_v63  ;;  %v5112_v23 = vld [vmem:[#allocation2 + $0x308] sm:$0xf0]  ;;  %v3774_v0 = vor.u32 %v5098_v49, %v3773_v47  ;;  %v4529_v49 = vld [vmem:[#allocation2 + $0x868] sm:$0xf]  ;;  %v5373_v54 = vld [vmem:[#allocation7 + $0x78] sm:$0xff] }
 0x134   :  { %2785 = vmatpush.bf16.msrb.mxu1 %v4162_v19  ;;  %v2528_v15 = vpop.f32.mrf.mxu1  ;;  %v3829_v19 = vld [vmem:[#allocation2 + $0x2f0] sm:$0xf] }
 0x135   :  { %2810 = vmatpush.bf16.msra.mxu2 %v4638_v11  ;;  %v4277_v11 = vld [vmem:[#allocation2 + $0x670] sm:$0xf]  ;;  %v2529_v25 = vadd.f32 %v2528_v15, %v5683_v12  ;;  %v3830_v30 = vor.u32 %v5112_v23, %v3829_v19  ;;  %v3549_v12 = vld [vmem:[#allocation2 + $0xc0] sm:$0xf]  ;;  %v3746_v15 = vor.u32 %v5091_v6, %v3745_v5  ;;  %v5196_v19 = vld [vmem:[#allocation2 + $0x5a8] sm:$0xf0]  ;;  %v3494_v23 = vor.u32 %v5028_v8, %v3493_v60 }
 0x136   :  { %2772 = vmatpush.bf16.msrb.mxu3 %v3938_v13  ;;  %v5224_v13 = vld [vmem:[#allocation2 + $0x688] sm:$0xf0]  ;;  %v4725_v6 = vld [vmem:[#allocation2 + $0x9f0] sm:$0xf] }
 0x137   :  { %2799 = vmatpush.bf16.msrb.mxu0 %v4358_v22  ;;  %v4278_v29 = vor.u32 %v5224_v13, %v4277_v11  ;;  %v5336_v60 = vld [vmem:[#allocation2 + $0xa08] sm:$0xf0] }
 0x138   :  { %2786 = vmatpush.bf16.msrb.mxu1 %v4134_v40  ;;  %v5692_v40 = vpop.f32.mrf.mxu0 }
 0x139   :  { %2811 = vmatpush.bf16.msra.mxu2 %v4610_v31  ;;  %v4249_v31 = vld [vmem:[#allocation2 + $0x638] sm:$0xf] }
 0x13a   :  { %2773 = vmatpush.bf16.msrb.mxu3 %v3910_v35  ;;  %2800 = vmatmul.bf16.vlgmr.msrb.gmra.mxu0 %v5625_v37  ;;  %v5105_v35 = vld [vmem:[#allocation2 + $0x2d0] sm:$0xf0]  ;;  %v4250_v22 = vor.u32 %v5217_v32, %v4249_v31  ;;  %v5294_v31 = vld [vmem:[#allocation2 + $0x8b8] sm:$0xf0]  ;;  %v4809_v32 = vld [vmem:[#allocation2 + $0xa98] sm:$0xf] }
 0x13b   :  { %2857 = vmatpush.bf16.msra.mxu0 %v4110_v46  ;;  %2787 = vmatmul.bf16.vlgmr.msrb.gmra.mxu1 %v5602_v56  ;;  %v3802_v41 = vor.u32 %v5105_v35, %v3801_v14  ;;  %v3998_v46 = vor.u32 %v5154_v39, %v3997_v38  ;;  %v3466_v38 = vor.u32 %v5021_v27, %v3465_v26  ;;  %v4669_v26 = vld [vmem:[#allocation2 + $0x980] sm:$0xf]  ;;  %v5322_v27 = vld [vmem:[#allocation2 + $0x998] sm:$0xf0] }
 0x13c   :  { %2831 = vmatpush.bf16.msra.mxu1 %v3662_v45  ;;  %v3550_v45 = vor.u32 %v5042_v36, %v3549_v12  ;;  %v4137_v12 = vld [vmem:[#allocation2 + $0x558] sm:$0xf]  ;;  %v5189_v36 = vld [vmem:[#allocation2 + $0x570] sm:$0xf0] }
 0x13d   :  { %2774 = vmatmul.bf16.vlgmr.msrb.gmra.mxu3 %v5600_v55  ;;  %2812 = vmatpush.bf16.msra.mxu2 %v4582_v51  ;;  %v2530_v51 = vpop.f32.mrf.mxu1  ;;  %v4138_v47 = vor.u32 %v5189_v36, %v4137_v12  ;;  %v5315_v12 = vld [vmem:[#allocation2 + $0x960] sm:$0xf0]  ;;  %v4389_v36 = vld [vmem:[#allocation2 + $0x750] sm:$0xf] }
 0x13e   :  { %2825 = vmatpush.bf16.msra.mxu3 %v4806_v58 }
 0x13f   :  { %2858 = vmatpush.bf16.msra.mxu0 %v4082_v3  ;;  %v3522_v3 = vor.u32 %v5035_v52, %v3521_v50  ;;  %v5287_v50 = vld [vmem:[#allocation2 + $0x880] sm:$0xf0] }
 0x140   :  { %2832 = vmatpush.bf16.msra.mxu1 %v3634_v2  ;;  %2813 = vmatmul.bf16.vlgmr.msra.gmra.mxu2 %v5627_v42  ;;  %v2541_v58 = vpop.f32.mrf.mxu3  ;;  %v5203_v2 = vld [vmem:[#allocation2 + $0x5e0] sm:$0xf0]  ;;  %v2582_v11 = vpop.f32.mrf.mxu0 }
 0x141   :  { %2870 = vmatpush.bf16.msrb.mxu2 %v4334_v59  ;;  %v4222_v59 = vor.u32 %v5210_v44, %v4221_v43  ;;  %v2542_v63 = vadd.f32 %v2541_v58, %v2529_v25  ;;  %v4194_v13 = vor.u32 %v5203_v2, %v4193_v1  ;;  %v5084_v25 = vld [vmem:[#allocation2 + $0x228] sm:$0xf0]  ;;  %v4530_v58 = vor.u32 %v5287_v50, %v4529_v49  ;;  %v4361_v49 = vld [vmem:[#allocation2 + $0x718] sm:$0xf]  ;;  %v5245_v50 = vld [vmem:[#allocation2 + $0x730] sm:$0xf0] }
 0x142   :  { %2844 = vmatpush.bf16.msrb.mxu3 %v3886_v61  ;;  %v5694_v61 = vpop.f32.mrf.mxu2  ;;  %v5280_v1 = vld [vmem:[#allocation2 + $0x848] sm:$0xf0] }
 0x143   :  { %2859 = vmatpush.bf16.msra.mxu0 %v4054_v18  ;;  %v5699_v7 = vadd.f32 %v5685_v17, %v2542_v63  ;;  %v4165_v18 = vld [vmem:[#allocation2 + $0x590] sm:$0xf]  ;;  %v3913_v17 = vld [vmem:[#allocation2 + $0x398] sm:$0xf]  ;;  %v5343_v63 = vld [vmem:[#allocation2 + $0xa40] sm:$0xf0] }
 0x144   :  { %2833 = vmatpush.bf16.msra.mxu1 %v3606_v16  ;;  %v3717_v16 = vld [vmem:[#allocation2 + $0x210] sm:$0xf]  ;;  %v3914_v39 = vor.u32 %v5133_v28, %v3913_v17  ;;  %v5363_v11 = vld [vmem:[#allocation7 + $0x28] sm:$0xff] }
 0x145   :  { %2871 = vmatpush.bf16.msrb.mxu2 %v4306_v9  ;;  %v3941_v9 = vld [vmem:[#allocation2 + $0x3d0] sm:$0xf]  ;;  %v3718_v35 = vor.u32 %v5084_v25, %v3717_v16  ;;  %v4697_v16 = vld [vmem:[#allocation2 + $0x9b8] sm:$0xf]  ;;  %v4417_v28 = vld [vmem:[#allocation2 + $0x788] sm:$0xf] }
 0x146   :  { %2845 = vmatpush.bf16.msrb.mxu3 %v3858_v10  ;;  %v5140_v10 = vld [vmem:[#allocation2 + $0x3e8] sm:$0xf0] }
 0x147   :  { %2860 = vmatpush.bf16.msra.mxu0 %v4026_v33  ;;  %v3942_v24 = vor.u32 %v5140_v10, %v3941_v9  ;;  %v4473_v9 = vld [vmem:[#allocation2 + $0x7f8] sm:$0xf]  ;;  %v5273_v10 = vld [vmem:[#allocation2 + $0x810] sm:$0xf0] }
 0x148   :  { %2834 = vmatpush.bf16.msra.mxu1 %v3578_v62  ;;  %v5357_v62 = vld [vmem:[#allocation2 + $0xab0] sm:$0xf0]  ;;  %v2543_v33 = vpop.f32.mrf.mxu3 }
 0x149   :  { %2872 = vmatpush.bf16.msrb.mxu2 %v4278_v29  ;;  %v4557_v29 = vld [vmem:[#allocation2 + $0x8a0] sm:$0xf]  ;;  %v4810_v44 = vor.u32 %v5357_v62, %v4809_v32  ;;  %v5361_v32 = vld [vmem:[#allocation7 + $0x18] sm:$0xff] }
 0x14a   :  { %2846 = vmatpush.bf16.msrb.mxu3 %v3830_v30  ;;  %v4166_v30 = vor.u32 %v5196_v19, %v4165_v18  ;;  %v2569_v14 = vpop.f32.mrf.mxu2  ;;  %v4558_v43 = vor.u32 %v5294_v31, %v4557_v29  ;;  %v5329_v18 = vld [vmem:[#allocation2 + $0x9d0] sm:$0xf0]  ;;  %v4445_v19 = vld [vmem:[#allocation2 + $0x7c0] sm:$0xf]  ;;  %v5259_v29 = vld [vmem:[#allocation2 + $0x7a0] sm:$0xf0]  ;;  %v4670_v31 = vor.u32 %v5322_v27, %v4669_v26 }
 0x14b   :  { %2861 = vmatpush.bf16.msra.mxu0 %v3998_v46  ;;  %v5350_v46 = vld [vmem:[#allocation2 + $0xa78] sm:$0xf0]  ;;  %v4418_v14 = vor.u32 %v5259_v29, %v4417_v28  ;;  %v5376_v26 = vld [vmem:[#allocation7 + $0x90] sm:$0xff] }
 0x14c   :  { %2835 = vmatpush.bf16.msra.mxu1 %v3550_v45  ;;  %v4781_v45 = vld [vmem:[#allocation2 + $0xa60] sm:$0xf]  ;;  %v5369_v33 = vld [vmem:[#allocation7 + $0x58] sm:$0xff] }
 0x14d   :  { %2873 = vmatpush.bf16.msrb.mxu2 %v4250_v22  ;;  %4816 = vmatmul.msk.bf16.vlgmr.msra.gmra.mxu3 %vm2281_vm0, %v5618_v48  ;;  %v3689_v22 = vld [vmem:[#allocation2 + $0x1d8] sm:$0xf]  ;;  %v4782_v52 = vor.u32 %v5350_v46, %v4781_v45  ;;  %v4613_v45 = vld [vmem:[#allocation2 + $0x910] sm:$0xf]  ;;  %v5308_v46 = vld [vmem:[#allocation2 + $0x928] sm:$0xf0] }
 0x14e   :  { %2847 = vmatpush.bf16.msrb.mxu3 %v3802_v41  ;;  %v5077_v41 = vld [vmem:[#allocation2 + $0x1f0] sm:$0xf0]  ;;  %v5393_v28 = vld [vmem:[#allocation7 + $0x118] sm:$0xff] }
 0x14f   :  { %2862 = vmatpush.bf16.msra.mxu0 %v3970_v4  ;;  %v3690_v51 = vor.u32 %v5077_v41, %v3689_v22  ;;  %v5372_v4 = vld [vmem:[#allocation7 + $0x70] sm:$0xff] }
 0x150   :  { %2836 = vmatpush.bf16.msra.mxu1 %v3522_v3  ;;  %v5364_v3 = vld [vmem:[#allocation7 + $0x30] sm:$0xff] }
 0x151   :  { %2874 = vmatpush.bf16.msrb.mxu2 %v4222_v59  ;;  %v4753_v59 = vld [vmem:[#allocation2 + $0xa28] sm:$0xf]  ;;  %v5360_v41 = vld [vmem:[#allocation7 + $0x10] sm:$0xff] }
 0x152   :  { %2848 = vmatpush.bf16.msrb.mxu3 %v3774_v0  ;;  %v4501_v0 = vld [vmem:[#allocation2 + $0x830] sm:$0xf]  ;;  %v4754_v2 = vor.u32 %v5343_v63, %v4753_v59  ;;  %v4585_v59 = vld [vmem:[#allocation2 + $0x8d8] sm:$0xf]  ;;  %v5301_v63 = vld [vmem:[#allocation2 + $0x8f0] sm:$0xf0] }
 0x153   :  { %2863 = vmatpush.bf16.msra.mxu0 %v3942_v24  ;;  %v4502_v5 = vor.u32 %v5280_v1, %v4501_v0  ;;  %v5381_v0 = vld [vmem:[#allocation7 + $0xb8] sm:$0xff]  ;;  %v4586_v1 = vor.u32 %v5301_v63, %v4585_v59  ;;  %v5402_v59 = vld [vmem:[#allocation7 + $0x160] sm:$0xff] }
 0x154   :  { %2837 = vmatpush.bf16.msra.mxu1 %v3494_v23  ;;  %v5702_v8 = vpop.f32.mrf.mxu1  ;;  %v5266_v23 = vld [vmem:[#allocation2 + $0x7d8] sm:$0xf0] }
 0x155   :  { %2875 = vmatpush.bf16.msrb.mxu2 %v4194_v13  ;;  %v5371_v13 = vld [vmem:[#allocation7 + $0x68] sm:$0xff]  ;;  %v4446_v25 = vor.u32 %v5266_v23, %v4445_v19  ;;  %v5378_v19 = vld [vmem:[#allocation7 + $0xa0] sm:$0xff] }
 0x156   :  { %2849 = vmatpush.bf16.msrb.mxu3 %v3746_v15  ;;  %v4474_v15 = vor.u32 %v5273_v10, %v4473_v9  ;;  %v5397_v10 = vld [vmem:[#allocation7 + $0x138] sm:$0xff] }
 0x157   :  { %2864 = vmatpush.bf16.msra.mxu0 %v3914_v39  ;;  %v5707_v24 = vpop.f32.mrf.mxu0 }
 0x158   :  { %2838 = vmatpush.bf16.msra.mxu1 %v3466_v38  ;;  %v5252_v38 = vld [vmem:[#allocation2 + $0x768] sm:$0xf0] }
 0x159   :  { %2876 = vmatpush.bf16.msrb.mxu2 %v4166_v30 }
 0x15a   :  { %2850 = vmatpush.bf16.msrb.mxu3 %v3718_v35  ;;  %2865 = vmatmul.bf16.vlgmr.msra.gmra.mxu0 %v5600_v55  ;;  %v4726_v55 = vor.u32 %v5336_v60, %v4725_v6  ;;  %v4641_v35 = vld [vmem:[#allocation2 + $0x948] sm:$0xf]  ;;  %v5717_v60 = vld [vmem:[#allocation5] sm:$0x7f] }
 0x15b   :  { %2916 = vmatpush.bf16.msrb.mxu0 %v4810_v44  ;;  %2839 = vmatmul.bf16.vlgmr.msra.gmra.mxu1 %v5609_v20  ;;  %v5362_v20 = vld [vmem:[#allocation7 + $0x20] sm:$0xff]  ;;  %v4642_v22 = vor.u32 %v5315_v12, %v4641_v35  ;;  %v4390_v44 = vor.u32 %v5252_v38, %v4389_v36  ;;  %v482_v9 = vperm.slane %v5717_v60, 3  ;;  %v5405_v35 = vld [vmem:[#allocation7 + $0x178] sm:$0xff]  ;;  %v5383_v12 = vld [vmem:[#allocation7 + $0xc8] sm:$0xff] }
 0x15c   :  { %2883 = vmatpush.bf16.msrb.mxu1 %v4558_v43  ;;  %v2595_v17 = vpop.f32.mrf.mxu1  ;;  %v5368_v43 = vld [vmem:[#allocation7 + $0x50] sm:$0xff]  ;;  %v5374_v36 = vld [vmem:[#allocation7 + $0x80] sm:$0xff] }
 0x15d   :  { %2877 = vmatpush.bf16.msrb.mxu2 %v4138_v47 }
 0x15e   :  { %2851 = vmatpush.bf16.msrb.mxu3 %v3690_v51  ;;  %v4614_v51 = vor.u32 %v5308_v46, %v4613_v45  ;;  %v5390_v46 = vld [vmem:[#allocation7 + $0x100] sm:$0xff] }
 0x15f   :  { %3341 = vmatpush.bf16.msra.mxu0 %v5373_v54  ;;  %v5711_v62 = vpop.f32.mrf.mxu2  ;;  %v2634_v39 = vpop.f32.mrf.mxu0  ;;  %v5367_v54 = vld [vmem:[#allocation7 + $0x48] sm:$0xff] }
 0x160   :  { %2884 = vmatpush.bf16.msrb.mxu1 %v4530_v58  ;;  %2878 = vmatmul.bf16.vlgmr.msrb.gmra.mxu2 %v5602_v56  ;;  %v5370_v56 = vld [vmem:[#allocation7 + $0x60] sm:$0xff]  ;;  %v5709_v30 = vpop.f32.mrf.mxu3  ;;  %v4362_v58 = vor.u32 %v5245_v50, %v4361_v49  ;;  %v5403_v49 = vld [vmem:[#allocation7 + $0x168] sm:$0xff] }
 0x161   :  { %3328 = vmatpush.bf16.msra.mxu2 %v5365_v53  ;;  %2852 = vmatmul.bf16.vlgmr.msrb.gmra.mxu3 %v5611_v21  ;;  %v4698_v21 = vor.u32 %v5329_v18, %v4697_v16  ;;  %v2568_v16 = vadd.f32 %v5694_v61, %v482_v9  ;;  %v5396_v18 = vld [vmem:[#allocation7 + $0x130] sm:$0xff] }
 0x162   :  { %2896 = vmatpush.bf16.msra.mxu3 %v4782_v52  ;;  %v5359_v52 = vld [vmem:[#allocation7 + $0x8] sm:$0xff] }
 0x163   :  { %3342 = vmatpush.bf16.msra.mxu0 %v5372_v4  ;;  %v5389_v4 = vld [vmem:[#allocation7 + $0xf8] sm:$0xff] }
 0x164   :  { %2885 = vmatpush.bf16.msrb.mxu1 %v4502_v5  ;;  %v5715_v47 = vpop.f32.mrf.mxu1  ;;  %v5380_v5 = vld [vmem:[#allocation7 + $0xb0] sm:$0xff] }
 0x165   :  { %3329 = vmatpush.bf16.msra.mxu2 %v5364_v3  ;;  %v5366_v3 = vld [vmem:[#allocation7 + $0x40] sm:$0xff] }
 0x166   :  { %2897 = vmatpush.bf16.msra.mxu3 %v4754_v2  ;;  %v5358_v2 = vld [vmem:[#allocation7] sm:$0xff] }
 0x167   :  { %3343 = vmatpush.bf16.msra.mxu0 %v5371_v13  ;;  %v2621_v53 = vpop.f32.mrf.mxu2  ;;  %v5388_v13 = vld [vmem:[#allocation7 + $0xf0] sm:$0xff] }
 0x168   :  { %2886 = vmatpush.bf16.msrb.mxu1 %v4474_v15  ;;  %v5379_v15 = vld [vmem:[#allocation7 + $0xa8] sm:$0xff] }
 0x169   :  { %3330 = vmatpush.bf16.msra.mxu2 %v5363_v11  ;;  %v2923_v11 = vpack.c.bf16 %v5676_v57, %v5676_v57  ;;  %v5395_v57 = vld [vmem:[#allocation7 + $0x128] sm:$0xff] }
 0x16a   :  { %2898 = vmatpush.bf16.msra.mxu3 %v4726_v55  ;;  %4817 = vmatmul.msk.bf16.vlgmr.msrb.gmra.mxu0 %vm2281_vm0, %v5618_v48  ;;  %v2608_v48 = vpop.f32.mrf.mxu3  ;;  %v2922_v55 = vpack.c.bf16 %v5660_v34, %v5660_v34  ;;  %v2581_v34 = vadd.f32 %v5692_v40, %v2568_v16 }
 0x16b   :  { %3344 = vmatpush.bf16.msra.mxu0 %v5370_v56 }
 0x16c   :  { %2887 = vmatpush.bf16.msrb.mxu1 %v4446_v25  ;;  %v2647_v6 = vpop.f32.mrf.mxu1  ;;  %v2594_v61 = vadd.f32 %v5702_v8, %v2581_v34  ;;  %v5385_v25 = vld [vmem:[#allocation7 + $0xd8] sm:$0xff] }
 0x16d   :  { %3331 = vmatpush.bf16.msra.mxu2 %v5362_v20  ;;  %v5377_v20 = vld [vmem:[#allocation7 + $0x98] sm:$0xff]  ;;  %v5400_v6 = vld [vmem:[#allocation7 + $0x150] sm:$0xff] }
 0x16e   :  { %2899 = vmatpush.bf16.msra.mxu3 %v4698_v21  ;;  %v5386_v21 = vld [vmem:[#allocation7 + $0xe0] sm:$0xff]  ;;  %v2607_v40 = vadd.f32 %v5709_v30, %v2594_v61 }
 0x16f   :  { %3345 = vmatpush.bf16.msra.mxu0 %v5369_v33  ;;  %v5392_v33 = vld [vmem:[#allocation7 + $0x110] sm:$0xff] }
 0x170   :  { %2888 = vmatpush.bf16.msrb.mxu1 %v4418_v14  ;;  %v2620_v8 = vadd.f32 %v5711_v62, %v2607_v40  ;;  %v5382_v62 = vld [vmem:[#allocation7 + $0xc0] sm:$0xff] }
 0x171   :  { %3332 = vmatpush.bf16.msra.mxu2 %v5361_v32  ;;  %v5375_v32 = vld [vmem:[#allocation7 + $0x88] sm:$0xff] }
 0x172   :  { %2900 = vmatpush.bf16.msra.mxu3 %v4670_v31  ;;  %v5384_v31 = vld [vmem:[#allocation7 + $0xd0] sm:$0xff]  ;;  %v2633_v30 = vadd.f32 %v5707_v24, %v2620_v8 }
 0x173   :  { %3346 = vmatpush.bf16.msra.mxu0 %v5368_v43  ;;  %v483_v43 = vperm.slane %v5717_v60, 4 }
 0x174   :  { %2889 = vmatpush.bf16.msrb.mxu1 %v4390_v44  ;;  %v2924_v44 = vpack.c.bf16 %v5699_v7, %v5699_v7  ;;  %v2646_v45 = vadd.f32 %v5715_v47, %v2633_v30 }
 0x175   :  { %3333 = vmatpush.bf16.msra.mxu2 %v5360_v41  ;;  %v5404_v41 = vld [vmem:[#allocation7 + $0x170] sm:$0xff] }
 0x176   :  { %2901 = vmatpush.bf16.msra.mxu3 %v4642_v22  ;;  %v5391_v22 = vld [vmem:[#allocation7 + $0x108] sm:$0xff] }
 0x177   :  { %3347 = vmatpush.bf16.msra.mxu0 %v5367_v54  ;;  %v2697_v56 = vpop.f32.mrf.mxu0 }
 0x178   :  { %2890 = vmatpush.bf16.msrb.mxu1 %v4362_v58  ;;  %v2671_v23 = vpop.f32.mrf.mxu1 }
 0x179   :  { %3334 = vmatpush.bf16.msra.mxu2 %v5359_v52 }
 0x17a   :  { %2902 = vmatpush.bf16.msra.mxu3 %v4614_v51  ;;  %v2925_v51 = vpack.c.bf16 %v2646_v45, %v2646_v45 }
 0x17b   :  { %2891 = vmatmul.bf16.vlgmr.msrb.gmra.mxu1 %v5625_v37  ;;  %3348 = vmatpush.bf16.msra.mxu0 %v5366_v3  ;;  %v5387_v37 = vld [vmem:[#allocation7 + $0xe8] sm:$0xff] }
 0x17c   :  { %3354 = vmatpush.bf16.msra.mxu1 %v5381_v0  ;;  %v5401_v0 = vld [vmem:[#allocation7 + $0x158] sm:$0xff] }
 0x17d   :  { %3335 = vmatpush.bf16.msra.mxu2 %v5358_v2 }
 0x17e   :  { %2903 = vmatpush.bf16.msra.mxu3 %v4586_v1  ;;  %3349 = vmatmul.bf16.vlgmr.msra.gmra.mxu0 %v2923_v11 }
 0x17f   :  { %v2684_v17 = vpop.f32.mrf.mxu2  ;;  %v2699_v14 = vpop.f32.mrf.mxu0  ;;  %3393 = vmatpush.bf16.msrb.mxu0 %v5405_v35 }
 0x180   :  { %3355 = vmatpush.bf16.msra.mxu1 %v5380_v5  ;;  %3336 = vmatmul.bf16.vlgmr.msra.gmra.mxu2 %v2922_v55  ;;  %v2658_v27 = vpop.f32.mrf.mxu3  ;;  %v2673_v29 = vpop.f32.mrf.mxu1  ;;  %v5399_v55 = vld [vmem:[#allocation7 + $0x148] sm:$0xff] }
 0x181   :  { %2904 = vmatmul.bf16.vlgmr.msra.gmra.mxu3 %v5627_v42  ;;  %3380 = vmatpush.bf16.msrb.mxu2 %v5397_v10  ;;  %v5394_v42 = vld [vmem:[#allocation7 + $0x120] sm:$0xff]  ;;  %v2659_v50 = vadd.f32 %v2658_v27, %v483_v43 }
 0x182   :  { %3367 = vmatpush.bf16.msrb.mxu3 %v5389_v4 }
 0x183   :  { %3394 = vmatpush.bf16.msrb.mxu0 %v5404_v41  ;;  %v2672_v52 = vadd.f32 %v2671_v23, %v2659_v50 }
 0x184   :  { %3356 = vmatpush.bf16.msra.mxu1 %v5379_v15  ;;  %v484_v15 = vperm.slane %v5717_v60, 5 }
 0x185   :  { %3381 = vmatpush.bf16.msrb.mxu2 %v5396_v18  ;;  %v2685_v48 = vadd.f32 %v2684_v17, %v2672_v52 }
 0x186   :  { %3368 = vmatpush.bf16.msrb.mxu3 %v5388_v13  ;;  %v5398_v13 = vld [vmem:[#allocation7 + $0x140] sm:$0xff] }
 0x187   :  { %v2686_v39 = vpop.f32.mrf.mxu2  ;;  %3395 = vmatpush.bf16.msrb.mxu0 %v5403_v49  ;;  %v2698_v7 = vadd.f32 %v2697_v56, %v2685_v48 }
 0x188   :  { %3357 = vmatpush.bf16.msra.mxu1 %v5378_v19  ;;  %v2660_v38 = vpop.f32.mrf.mxu3 }
 0x189   :  { %3382 = vmatpush.bf16.msrb.mxu2 %v5395_v57 }
 0x18a   :  { %3369 = vmatpush.bf16.msrb.mxu3 %v5387_v37 }
 0x18b   :  { %3396 = vmatpush.bf16.msrb.mxu0 %v5402_v59 }
 0x18c   :  { %3358 = vmatpush.bf16.msra.mxu1 %v5377_v20 }
 0x18d   :  { %3383 = vmatpush.bf16.msrb.mxu2 %v5394_v42 }
 0x18e   :  { %3370 = vmatpush.bf16.msrb.mxu3 %v5386_v21 }
 0x18f   :  { %v2736_v24 = vpop.f32.mrf.mxu2  ;;  %3397 = vmatpush.bf16.msrb.mxu0 %v5401_v0 }
 0x190   :  { %3359 = vmatpush.bf16.msra.mxu1 %v5376_v26 }
 0x191   :  { %3384 = vmatpush.bf16.msrb.mxu2 %v5393_v28  ;;  %v5406_v28 = vld [vmem:[#allocation7 + $0x180] sm:$0xff] }
 0x192   :  { %3371 = vmatpush.bf16.msrb.mxu3 %v5385_v25 }
 0x193   :  { %3398 = vmatpush.bf16.msrb.mxu0 %v5400_v6 }
 0x194   :  { %3360 = vmatpush.bf16.msra.mxu1 %v5375_v32 }
 0x195   :  { %3385 = vmatpush.bf16.msrb.mxu2 %v5392_v33 }
 0x196   :  { %3372 = vmatpush.bf16.msrb.mxu3 %v5384_v31 }
 0x197   :  { %v2738_v54 = vpop.f32.mrf.mxu2  ;;  %v2749_v58 = vpop.f32.mrf.mxu0  ;;  %3399 = vmatpush.bf16.msrb.mxu0 %v5399_v55 }
 0x198   :  { %3361 = vmatpush.bf16.msra.mxu1 %v5374_v36  ;;  %v2723_v53 = vpop.f32.mrf.mxu1  ;;  %v2750_v16 = vadd.f32 %v2749_v58, %v484_v15  ;;  %v485_v36 = vperm.slane %v5717_v60, 6 }
 0x199   :  { %3386 = vmatpush.bf16.msrb.mxu2 %v5391_v22 }
 0x19a   :  { %3373 = vmatpush.bf16.msrb.mxu3 %v5383_v12 }
 0x19b   :  { %3362 = vmatmul.bf16.vlgmr.msra.gmra.mxu1 %v2924_v44  ;;  %3400 = vmatpush.bf16.msrb.mxu0 %v5398_v13 }
 0x19c   :  { %3413 = vmatpush.bf16.msrb.mxu1 %v5406_v28 }
 0x19d   :  { %3387 = vmatpush.bf16.msrb.mxu2 %v5390_v46  ;;  %v5416_v46 = vld [vmem:[#allocation8] ss:$0 sm:$0xff] }
 0x19e   :  { %3374 = vmatpush.bf16.msrb.mxu3 %v5382_v62 }
 0x19f   :  { %v2751_v4 = vpop.f32.mrf.mxu0 }
 0x1a0   :  { %v2710_v47 = vpop.f32.mrf.mxu3  ;;  %v2725_v2 = vpop.f32.mrf.mxu1 }
 0x1a1   :  { %3375 = vmatmul.bf16.vlgmr.msrb.gmra.mxu3 %v2925_v51  ;;  %v2711_v63 = vadd.f32 %v2710_v47, %v2698_v7 }
 0x1a3   :  { %v2724_v1 = vadd.f32 %v2723_v53, %v2711_v63  ;;  %v2762_v3 = vpop.f32.mrf.mxu2 }
 0x1a4   :  { %v2763_v19 = vadd.f32 %v2762_v3, %v2750_v16 }
 0x1a5   :  { %v2737_v5 = vadd.f32 %v2736_v24, %v2724_v1 }
 0x1a7   :  { %v2926_v9 = vpack.c.bf16 %v2737_v5, %v2737_v5 }
 0x1a8   :  { %v2712_v10 = vpop.f32.mrf.mxu3 }
 0x1a9   :  { %3388 = vmatmul.bf16.vlgmr.msrb.gmra.mxu2 %v2926_v9 }
 0x1ab   :  { %v2764_v11 = vpop.f32.mrf.mxu2 }
 0x1b7   :  { %v2801_v37 = vpop.f32.mrf.mxu0 }
 0x1b8   :  { %v2788_v18 = vpop.f32.mrf.mxu1 }
 0x1bf   :  { %v2803_v20 = vpop.f32.mrf.mxu0 }
 0x1c0   :  { %v2775_v34 = vpop.f32.mrf.mxu3  ;;  %v2790_v21 = vpop.f32.mrf.mxu1 }
 0x1c1   :  { %v2776_v57 = vadd.f32 %v2775_v34, %v2763_v19 }
 0x1c3   :  { %v2814_v23 = vpop.f32.mrf.mxu2  ;;  %v2789_v61 = vadd.f32 %v2788_v18, %v2776_v57 }
 0x1c5   :  { %v2802_v56 = vadd.f32 %v2801_v37, %v2789_v61 }
 0x1c7   :  { %v2815_v26 = vadd.f32 %v2814_v23, %v2802_v56 }
 0x1c8   :  { %v2777_v42 = vpop.f32.mrf.mxu3 }
 0x1cb   :  { %v2816_v25 = vpop.f32.mrf.mxu2 }
 0x1d0   :  { %v2827_v27 = vpop.f32.mrf.mxu3 }
 0x1d1   :  { %v2828_v17 = vadd.f32 %v2827_v27, %v2815_v26 }
 0x1d3   :  { %v2927_v40 = vpack.c.bf16 %v2828_v17, %v2828_v17 }
 0x1d5   :  { %3401 = vmatmul.bf16.vlgmr.msrb.gmra.mxu0 %v2927_v40 }
 0x1d7   :  { %v2866_v29 = vpop.f32.mrf.mxu0 }
 0x1d8   :  { %v2829_v31 = vpop.f32.mrf.mxu3  ;;  %v2840_v32 = vpop.f32.mrf.mxu1 }
 0x1d9   :  { %v2841_v30 = vadd.f32 %v2840_v32, %v485_v36 }
 0x1df   :  { %v2868_v8 = vpop.f32.mrf.mxu0 }
 0x1e0   :  { %v2842_v35 = vpop.f32.mrf.mxu1 }
 0x1e3   :  { %v2879_v14 = vpop.f32.mrf.mxu2 }
 0x1e4   :  { %v2853_v33 = vpop.f32.mrf.mxu3 }
 0x1e5   :  { %v2854_v41 = vadd.f32 %v2853_v33, %v2841_v30 }
 0x1e7   :  { %v2918_v12 = vpop.f32.mrf.mxu0  ;;  %v2867_v43 = vadd.f32 %v2866_v29, %v2854_v41 }
 0x1e9   :  { %v2880_v44 = vadd.f32 %v2879_v14, %v2867_v43 }
 0x1eb   :  { %v2881_v39 = vpop.f32.mrf.mxu2 }
 0x1ec   :  { %v2855_v38 = vpop.f32.mrf.mxu3 }
 0x1ef   :  { %v2920_v22 = vpop.f32.mrf.mxu0 }
 0x1f8   :  { %v2892_v62 = vpop.f32.mrf.mxu1 }
 0x1f9   :  { %v2893_v49 = vadd.f32 %v2892_v62, %v2880_v44 }
 0x1fb   :  { %v3350_v45 = vpop.f32.mrf.mxu0 }
 0x200   :  { %v2894_v50 = vpop.f32.mrf.mxu1 }
 0x203   :  { %v3337_v52 = vpop.f32.mrf.mxu2  ;;  %v3352_v54 = vpop.f32.mrf.mxu0 }
 0x204   :  { %v2905_v24 = vpop.f32.mrf.mxu3  ;;  %v3338_v48 = vadd.f32 %v5416_v46, %v3337_v52 }
 0x205   :  { %v2906_v51 = vadd.f32 %v2905_v24, %v2893_v49 }
 0x206   :  { %v3351_v58 = vadd.f32 %v3350_v45, %v3338_v48 }
 0x207   :  { %v2919_v53 = vadd.f32 %v2918_v12, %v2906_v51 }
 0x209   :  { %v2928_v60 = vpack.c.bf16 %v2919_v53, %v2919_v53 }
 0x20b   :  { %5014 = vmatmul.msk.bf16.vlgmr.msrb.gmra.mxu1 %vm2281_vm0, %v2928_v60  ;;  %v3339_v59 = vpop.f32.mrf.mxu2 }
 0x20c   :  { %v2907_v7 = vpop.f32.mrf.mxu3 }
 0x218   :  { %v3363_v47 = vpop.f32.mrf.mxu1 }
 0x219   :  { %v3364_v63 = vadd.f32 %v3363_v47, %v3351_v58 }
 0x220   :  { %v3365_v0 = vpop.f32.mrf.mxu1 }
 0x224   :  { %v3376_v1 = vpop.f32.mrf.mxu3 }
 0x225   :  { %v3377_v2 = vadd.f32 %v3376_v1, %v3364_v63 }
 0x22c   :  { %v3378_v3 = vpop.f32.mrf.mxu3  ;;  %v3389_v4 = vpop.f32.mrf.mxu2 }
 0x22d   :  { %v3390_v5 = vadd.f32 %v3389_v4, %v3377_v2 }
 0x234   :  { %v3391_v6 = vpop.f32.mrf.mxu2 }
 0x252   :  { %v3402_v9 = vpop.f32.mrf.mxu0 }
 0x253   :  { %v3403_v55 = vadd.f32 %v3402_v9, %v3390_v5 }
 0x25a   :  { %v3404_v10 = vpop.f32.mrf.mxu0 }
 0x288   :  { %v3415_v11 = vpop.f32.mrf.mxu1 }
 0x289   :  { %v3416_v13 = vadd.f32 %v3415_v11, %v3403_v55 }
 0x28b   :  { %3419 = vst [vmem:[#allocation10] sm:$0xff] %v3416_v13 }
 0x28c   :  { %3430 = dma.vmem_to_hbm [thread:$0]  %s3426_s21, 128, %s3428_s24, [#allocation4]  }
 0x290   :  { %v3417_v15 = vpop.f32.mrf.mxu1 }
 0x291   :  { %5544 = dma.done.wait [#allocation4], 128  }
 0x292   :  { %5545 = vsyncadd [#allocation4], 4294967168 }
 0x293   :  { %3435 = vsyncpa [#allocation3], 1 }
 0x294   :  { %3436 = vsyncpa [#allocation6], 1 }
 0x295   :  { %3437 = vsyncpa [#allocation9], 1 }
 0x296   :  { %3438 = vsyncpa [#allocation4], 1 }

</bundles_post_ra>
